<compile_context>
chip_gen: v5e
topology: v5e:2x2
jax: 0.10.0
libtpu: 0.0.40
codegen_flags: <defaults>
</compile_context>

<pallas_src>
import functools

import jax
import jax.numpy as jnp
from jax.experimental import pallas as pl

# Small synthetic shapes consistent with a sentence-transformer style encoder.
B = 2            # batch (number of sentences)
S = 8            # sequence length (tokens)
BS = B * S       # flattened token axis
H = 32           # hidden size (sentence embedding dim)
NH = 4           # attention heads
DH = H // NH     # head dim
FF = 64          # feed-forward width
NL = 2           # encoder layers
VOCAB = 128      # synthetic vocab size (lane-dense for the one-hot gather matmul)


def _layer_norm(x, g, b, eps=1e-12):
    mu = jnp.mean(x, axis=-1, keepdims=True)
    xc = x - mu
    var = jnp.mean(xc * xc, axis=-1, keepdims=True)
    return xc * jax.lax.rsqrt(var + eps) * g + b


def fused_encoder_kernel(ids_ref, key_bias_ref, pool_ref, tok_ref, pos_ref,
                         wqkv_ref, bqkv_ref, wo_ref, bo_ref, g1_ref, b1_ref,
                         w1_ref, c1_ref, w2_ref, c2_ref, g2_ref, b2_ref,
                         o_ref, *, normalize):
    """Whole forward pass: embedding gather + NL layers + masked mean pooling.

    ids_ref      : (BS, 1)  int32 token ids (all sentences flattened)
    key_bias_ref : (B, 1, S) additive key-padding bias (0 valid, -1e9 pad)
    pool_ref     : (BS, 1)  per-token masked-mean weight (mask/count)
    tok_ref      : (VOCAB, H) bf16 token embedding table
    pos_ref      : (S, H)   f32 positional embeddings
    weights      : stacked across layers; QKV fused, bf16 storage.
    o_ref        : (B, H)   sentence embeddings
    """
    # --- Embedding lookup as a one-hot MXU matmul (in-kernel gather) ---
    ids = ids_ref[...]                                             # (BS, 1) i32
    vocab_iota = jax.lax.broadcasted_iota(jnp.int32, (BS, VOCAB), 1)
    onehot = jnp.where(vocab_iota == ids, 1.0, 0.0).astype(jnp.bfloat16)
    x = jnp.dot(onehot, tok_ref[...], preferred_element_type=jnp.float32)
    x = x + jnp.tile(pos_ref[...], (B, 1))                         # (BS, H) f32

    # Hoisted loop-invariant: key-padding bias broadcast to (B, S, S) once.
    bias_qk = jnp.broadcast_to(key_bias_ref[...], (B, S, S))       # f32

    # NL=2: static unroll; all activations + weights stay in VMEM (~45 KiB).
    for l in range(NL):
        xb = x.astype(jnp.bfloat16)
        # Fused QKV projection: one (BS,H)@(H,3H) bf16 matmul, f32 accumulation.
        # (1/sqrt(DH) is pre-folded into the Q columns on the host.)
        qkv = jnp.dot(xb, wqkv_ref[l],
                      preferred_element_type=jnp.float32) + bqkv_ref[l]
        qkv = qkv.reshape(B, S, 3 * H)            # leading-dim split only (free)

        # Per-head score/context contractions, batched over the sentence axis.
        ctx_heads = []
        for h in range(NH):
            qo, ko, vo = h * DH, H + h * DH, 2 * H + h * DH
            q_h = qkv[:, :, qo:qo + DH].astype(jnp.bfloat16)       # (B, S, DH)
            k_h = qkv[:, :, ko:ko + DH].astype(jnp.bfloat16)
            v_h = qkv[:, :, vo:vo + DH].astype(jnp.bfloat16)

            s = jnp.einsum('bqd,bkd->bqk', q_h, k_h,
                           preferred_element_type=jnp.float32) + bias_qk
            s = s - jnp.max(s, axis=-1, keepdims=True)
            e = jnp.exp(s)
            p = e * pl.reciprocal(jnp.sum(e, axis=-1, keepdims=True), approx=True)

            ctx_heads.append(
                jnp.einsum('bqk,bkd->bqd', p.astype(jnp.bfloat16), v_h,
                           preferred_element_type=jnp.float32))    # (B, S, DH)

        # concat(heads) @ W_o : a single full-width output-projection matmul.
        ctx = jnp.concatenate(ctx_heads, axis=-1).reshape(BS, H)
        attn = jnp.dot(ctx.astype(jnp.bfloat16), wo_ref[l],
                       preferred_element_type=jnp.float32) + bo_ref[l]

        h1 = _layer_norm(x + attn, g1_ref[l], b1_ref[l])

        f = jnp.dot(h1.astype(jnp.bfloat16), w1_ref[l],
                    preferred_element_type=jnp.float32) + c1_ref[l]
        # TODO(synk): BERT uses exact erf GELU; tanh approximation kept for
        # EUP-friendly lowering (tiny numeric deviation from the reference).
        f = jax.nn.gelu(f, approximate=True)
        f = jnp.dot(f.astype(jnp.bfloat16), w2_ref[l],
                    preferred_element_type=jnp.float32) + c2_ref[l]

        x = _layer_norm(h1 + f, g2_ref[l], b2_ref[l])

    # Masked mean pooling: per-token weight (mask/count) broadcast along lanes,
    # then a cross-sublane reduction per sentence.
    xw = x * pool_ref[...]                                         # (BS, H)
    pooled = jnp.sum(xw.reshape(B, S, H), axis=1)                  # (B, H)
    if normalize:
        pooled = pooled * jax.lax.rsqrt(
            jnp.sum(pooled * pooled, axis=-1, keepdims=True) + 1e-12)
    o_ref[...] = pooled


def init_params(key):
    ks = jax.random.split(key, 6)

    def mat(k, shape, scale=0.05):
        return (scale * jax.random.normal(k, shape)).astype(jnp.float32)

    tok_emb = mat(ks[0], (VOCAB, H), 0.1).astype(jnp.bfloat16)
    pos_emb = mat(ks[1], (S, H), 0.02)                 # f32 (elementwise add)

    # Fused QKV weight; fold the 1/sqrt(DH) attention scale into the Q columns
    # (the Q bias is zero, so this is exactly equivalent).
    wqkv = mat(ks[2], (NL, H, 3 * H))
    wqkv = wqkv.at[:, :, :H].multiply(1.0 / float(DH) ** 0.5).astype(jnp.bfloat16)
    wo = mat(ks[3], (NL, H, H)).astype(jnp.bfloat16)
    w1 = mat(ks[4], (NL, H, FF)).astype(jnp.bfloat16)
    w2 = mat(ks[5], (NL, FF, H)).astype(jnp.bfloat16)

    zeros_3h = jnp.zeros((NL, 1, 3 * H), jnp.float32)
    zeros_h = jnp.zeros((NL, 1, H), jnp.float32)
    ones_h = jnp.ones((NL, 1, H), jnp.float32)
    zeros_ff = jnp.zeros((NL, 1, FF), jnp.float32)

    params = (
        wqkv, zeros_3h,        # fused QKV weight (bf16) + bias (f32)
        wo, zeros_h,           # output projection
        ones_h, zeros_h,       # LN1 gamma / beta
        w1, zeros_ff,          # FFN in
        w2, zeros_h,           # FFN out
        ones_h, zeros_h,       # LN2 gamma / beta
    )
    return tok_emb, pos_emb, params


@functools.partial(jax.jit, static_argnames=("normalize_embeddings",))
def encode(token_ids, attention_mask, tok_emb, pos_emb, params,
           normalize_embeddings=False):
    """Equivalent of CustomEncoder.forward on pre-tokenized input.

    token_ids:      int32 [B, S]
    attention_mask: [B, S] with 1 for real tokens, 0 for padding
    returns float32 [B, H] sentence embeddings.
    """
    # TODO(synk): raw-string tokenization and the length-sort/unsort batching of
    # the original forward have no Pallas equivalent; fixed-length ids are used.
    ids = token_ids.reshape(BS, 1).astype(jnp.int32)
    mask = attention_mask.astype(jnp.float32)                      # (B, S)

    # Tiny mask-derived operands in the exact layouts the kernel consumes
    # (replaces the old O((B*S)^2) block-diagonal bias and (B, B*S) pool matrix).
    key_bias = ((mask - 1.0) * 1e9)[:, None, :]                    # (B, 1, S)
    counts = jnp.maximum(jnp.sum(mask, axis=-1, keepdims=True), 1e-9)
    pool_w = (mask / counts).reshape(BS, 1)                        # (BS, 1)

    kernel = functools.partial(fused_encoder_kernel,
                               normalize=normalize_embeddings)
    # Single fused pallas_call, no grid: whole problem (~2 KiB activations,
    # ~45 KiB weights) lives in VMEM; defaults place every whole array in VMEM.
    return pl.pallas_call(
        kernel,
        out_shape=jax.ShapeDtypeStruct((B, H), jnp.float32),
    )(ids, key_bias, pool_w, tok_emb, pos_emb, *params)


if __name__ == "__main__":
    key = jax.random.PRNGKey(0)
    k_ids, k_params = jax.random.split(key)

    token_ids = jax.random.randint(k_ids, (B, S), 0, VOCAB, dtype=jnp.int32)
    # second sentence "shorter": last 3 tokens are padding
    attention_mask = jnp.array(
        [[1, 1, 1, 1, 1, 1, 1, 1],
         [1, 1, 1, 1, 1, 0, 0, 0]], dtype=jnp.int32)

    tok_emb, pos_emb, params = init_params(k_params)

    emb = encode(token_ids, attention_mask, tok_emb, pos_emb, params,
                 normalize_embeddings=True)
    emb = jax.block_until_ready(emb)

    assert emb.shape == (B, H)
    assert bool(jnp.all(jnp.isfinite(emb)))
    # normalized embeddings should have unit L2 norm
    norms = jnp.sqrt(jnp.sum(emb * emb, axis=-1))
    assert bool(jnp.all(jnp.abs(norms - 1.0) < 1e-3))
    print("KERNEL_OK")
</pallas_src>

<mosaic_0001>
module attributes {stable_mosaic.version = 11 : i64} {
  func.func @fused_encoder_kernel(%arg0: memref<16x1xi32, #tpu.memory_space<vmem>>, %arg1: memref<2x1x8xf32, #tpu.memory_space<vmem>>, %arg2: memref<16x1xf32, #tpu.memory_space<vmem>>, %arg3: memref<128x32xbf16, #tpu.memory_space<vmem>>, %arg4: memref<8x32xf32, #tpu.memory_space<vmem>>, %arg5: memref<2x32x96xbf16, #tpu.memory_space<vmem>>, %arg6: memref<2x1x96xf32, #tpu.memory_space<vmem>>, %arg7: memref<2x32x32xbf16, #tpu.memory_space<vmem>>, %arg8: memref<2x1x32xf32, #tpu.memory_space<vmem>>, %arg9: memref<2x1x32xf32, #tpu.memory_space<vmem>>, %arg10: memref<2x1x32xf32, #tpu.memory_space<vmem>>, %arg11: memref<2x32x64xbf16, #tpu.memory_space<vmem>>, %arg12: memref<2x1x64xf32, #tpu.memory_space<vmem>>, %arg13: memref<2x64x32xbf16, #tpu.memory_space<vmem>>, %arg14: memref<2x1x32xf32, #tpu.memory_space<vmem>>, %arg15: memref<2x1x32xf32, #tpu.memory_space<vmem>>, %arg16: memref<2x1x32xf32, #tpu.memory_space<vmem>>, %arg17: memref<2x32xf32, #tpu.memory_space<vmem>>) attributes {dimension_semantics = [], scalar_prefetch = 0 : i64, scratch_operands = 0 : i64, tpu.core_type = #tpu.core_type<tc>} {
    %c0 = arith.constant 0 : index
    %c0_0 = arith.constant 0 : index
    %0 = vector.load %arg0[%c0, %c0_0] : memref<16x1xi32, #tpu.memory_space<vmem>>, vector<16x1xi32>
    %1 = tpu.iota {dimensions = array<i32: 1>} : vector<16x128xi32>
    %2 = vector.broadcast %0 : vector<16x1xi32> to vector<16x128xi32>
    %3 = arith.cmpi eq, %1, %2 : vector<16x128xi32>
    %cst = arith.constant 1.000000e+00 : f32
    %cst_1 = arith.constant 0.000000e+00 : f32
    %4 = vector.broadcast %cst : f32 to vector<16x128xf32>
    %5 = vector.broadcast %cst_1 : f32 to vector<16x128xf32>
    %6 = arith.select %3, %4, %5 : vector<16x128xi1>, vector<16x128xf32>
    %7 = arith.truncf %6 : vector<16x128xf32> to vector<16x128xbf16>
    %c0_2 = arith.constant 0 : index
    %c0_3 = arith.constant 0 : index
    %8 = vector.load %arg3[%c0_2, %c0_3] : memref<128x32xbf16, #tpu.memory_space<vmem>>, vector<128x32xbf16>
    %cst_4 = arith.constant dense<0.000000e+00> : vector<16x32xf32>
    %9 = tpu.matmul %7, %8, %cst_4 {dimension_numbers = #tpu.dot_dimension_numbers<[1], [0], [0], [1], [0, 0, 1, 1], [], []>} : vector<16x128xbf16>, vector<128x32xbf16>, vector<16x32xf32> -> vector<16x32xf32>
    %c0_5 = arith.constant 0 : index
    %c0_6 = arith.constant 0 : index
    %10 = vector.load %arg4[%c0_5, %c0_6] : memref<8x32xf32, #tpu.memory_space<vmem>>, vector<8x32xf32>
    %11 = tpu.concatenate %10, %10 in 0 : vector<8x32xf32>, vector<8x32xf32> -> vector<16x32xf32>
    %12 = arith.addf %9, %11 : vector<16x32xf32>
    %c0_7 = arith.constant 0 : index
    %c0_8 = arith.constant 0 : index
    %c0_9 = arith.constant 0 : index
    %13 = vector.load %arg1[%c0_7, %c0_8, %c0_9] : memref<2x1x8xf32, #tpu.memory_space<vmem>>, vector<2x1x8xf32>
    %14 = vector.shape_cast %13 : vector<2x1x8xf32> to vector<2x1x8xf32>
    %15 = vector.broadcast %14 : vector<2x1x8xf32> to vector<2x8x8xf32>
    %16 = arith.truncf %12 : vector<16x32xf32> to vector<16x32xbf16>
    %c0_10 = arith.constant 0 : index
    %c0_11 = arith.constant 0 : index
    %c0_12 = arith.constant 0 : index
    %17 = vector.load %arg5[%c0_10, %c0_11, %c0_12] : memref<2x32x96xbf16, #tpu.memory_space<vmem>>, vector<1x32x96xbf16>
    %18 = vector.shape_cast %17 : vector<1x32x96xbf16> to vector<32x96xbf16>
    %cst_13 = arith.constant dense<0.000000e+00> : vector<16x96xf32>
    %19 = tpu.matmul %16, %18, %cst_13 {dimension_numbers = #tpu.dot_dimension_numbers<[1], [0], [0], [1], [0, 0, 1, 1], [], []>} : vector<16x32xbf16>, vector<32x96xbf16>, vector<16x96xf32> -> vector<16x96xf32>
    %c0_14 = arith.constant 0 : index
    %c0_15 = arith.constant 0 : index
    %c0_16 = arith.constant 0 : index
    %20 = vector.load %arg6[%c0_14, %c0_15, %c0_16] : memref<2x1x96xf32, #tpu.memory_space<vmem>>, vector<1x1x96xf32>
    %21 = vector.shape_cast %20 : vector<1x1x96xf32> to vector<1x96xf32>
    %22 = vector.broadcast %21 : vector<1x96xf32> to vector<16x96xf32>
    %23 = arith.addf %19, %22 : vector<16x96xf32>
    %24 = vector.shape_cast %23 : vector<16x96xf32> to vector<2x8x96xf32>
    %25 = vector.extract_strided_slice %24 {offsets = [0, 0, 0], sizes = [2, 8, 8], strides = [1, 1, 1]} : vector<2x8x96xf32> to vector<2x8x8xf32>
    %26 = arith.truncf %25 : vector<2x8x8xf32> to vector<2x8x8xbf16>
    %27 = vector.extract_strided_slice %24 {offsets = [0, 0, 32], sizes = [2, 8, 8], strides = [1, 1, 1]} : vector<2x8x96xf32> to vector<2x8x8xf32>
    %28 = arith.truncf %27 : vector<2x8x8xf32> to vector<2x8x8xbf16>
    %29 = vector.extract_strided_slice %24 {offsets = [0, 0, 64], sizes = [2, 8, 8], strides = [1, 1, 1]} : vector<2x8x96xf32> to vector<2x8x8xf32>
    %30 = arith.truncf %29 : vector<2x8x8xf32> to vector<2x8x8xbf16>
    "tpu.trace_start"() <{level = 10 : i32, message = "bqd,bkd->bqk"}> : () -> ()
    %cst_17 = arith.constant dense<0.000000e+00> : vector<2x8x8xf32>
    %31 = tpu.matmul %26, %28, %cst_17 {dimension_numbers = #tpu.dot_dimension_numbers<[2], [2], [1], [1], [0, 0, 0, 1, 1, 1], [0], [0]>} : vector<2x8x8xbf16>, vector<2x8x8xbf16>, vector<2x8x8xf32> -> vector<2x8x8xf32>
    "tpu.trace_stop"() : () -> ()
    %32 = arith.addf %31, %15 : vector<2x8x8xf32>
    %cst_18 = arith.constant dense<0xFF800000> : vector<2x8xf32>
    %33 = vector.multi_reduction <maximumf>, %32, %cst_18 [2] : vector<2x8x8xf32> to vector<2x8xf32>
    %34 = vector.shape_cast %33 : vector<2x8xf32> to vector<2x8x1xf32>
    %35 = vector.broadcast %34 : vector<2x8x1xf32> to vector<2x8x8xf32>
    %36 = arith.subf %32, %35 : vector<2x8x8xf32>
    %37 = math.exp %36 : vector<2x8x8xf32>
    %cst_19 = arith.constant dense<0.000000e+00> : vector<2x8xf32>
    %38 = vector.multi_reduction <add>, %37, %cst_19 [2] : vector<2x8x8xf32> to vector<2x8xf32>
    %39 = vector.shape_cast %38 : vector<2x8xf32> to vector<2x8x1xf32>
    %40 = tpu.reciprocal %39 {approx = true} : vector<2x8x1xf32> -> vector<2x8x1xf32>
    %41 = vector.broadcast %40 : vector<2x8x1xf32> to vector<2x8x8xf32>
    %42 = arith.mulf %37, %41 : vector<2x8x8xf32>
    %43 = arith.truncf %42 : vector<2x8x8xf32> to vector<2x8x8xbf16>
    "tpu.trace_start"() <{level = 10 : i32, message = "bqk,bkd->bqd"}> : () -> ()
    %cst_20 = arith.constant dense<0.000000e+00> : vector<2x8x8xf32>
    %44 = tpu.matmul %43, %30, %cst_20 {dimension_numbers = #tpu.dot_dimension_numbers<[2], [1], [1], [2], [0, 0, 0, 1, 1, 2], [0], [0]>} : vector<2x8x8xbf16>, vector<2x8x8xbf16>, vector<2x8x8xf32> -> vector<2x8x8xf32>
    "tpu.trace_stop"() : () -> ()
    %45 = vector.extract_strided_slice %24 {offsets = [0, 0, 8], sizes = [2, 8, 8], strides = [1, 1, 1]} : vector<2x8x96xf32> to vector<2x8x8xf32>
    %46 = arith.truncf %45 : vector<2x8x8xf32> to vector<2x8x8xbf16>
    %47 = vector.extract_strided_slice %24 {offsets = [0, 0, 40], sizes = [2, 8, 8], strides = [1, 1, 1]} : vector<2x8x96xf32> to vector<2x8x8xf32>
    %48 = arith.truncf %47 : vector<2x8x8xf32> to vector<2x8x8xbf16>
    %49 = vector.extract_strided_slice %24 {offsets = [0, 0, 72], sizes = [2, 8, 8], strides = [1, 1, 1]} : vector<2x8x96xf32> to vector<2x8x8xf32>
    %50 = arith.truncf %49 : vector<2x8x8xf32> to vector<2x8x8xbf16>
    "tpu.trace_start"() <{level = 10 : i32, message = "bqd,bkd->bqk"}> : () -> ()
    %cst_21 = arith.constant dense<0.000000e+00> : vector<2x8x8xf32>
    %51 = tpu.matmul %46, %48, %cst_21 {dimension_numbers = #tpu.dot_dimension_numbers<[2], [2], [1], [1], [0, 0, 0, 1, 1, 1], [0], [0]>} : vector<2x8x8xbf16>, vector<2x8x8xbf16>, vector<2x8x8xf32> -> vector<2x8x8xf32>
    "tpu.trace_stop"() : () -> ()
    %52 = arith.addf %51, %15 : vector<2x8x8xf32>
    %cst_22 = arith.constant dense<0xFF800000> : vector<2x8xf32>
    %53 = vector.multi_reduction <maximumf>, %52, %cst_22 [2] : vector<2x8x8xf32> to vector<2x8xf32>
    %54 = vector.shape_cast %53 : vector<2x8xf32> to vector<2x8x1xf32>
    %55 = vector.broadcast %54 : vector<2x8x1xf32> to vector<2x8x8xf32>
    %56 = arith.subf %52, %55 : vector<2x8x8xf32>
    %57 = math.exp %56 : vector<2x8x8xf32>
    %cst_23 = arith.constant dense<0.000000e+00> : vector<2x8xf32>
    %58 = vector.multi_reduction <add>, %57, %cst_23 [2] : vector<2x8x8xf32> to vector<2x8xf32>
    %59 = vector.shape_cast %58 : vector<2x8xf32> to vector<2x8x1xf32>
    %60 = tpu.reciprocal %59 {approx = true} : vector<2x8x1xf32> -> vector<2x8x1xf32>
    %61 = vector.broadcast %60 : vector<2x8x1xf32> to vector<2x8x8xf32>
    %62 = arith.mulf %57, %61 : vector<2x8x8xf32>
    %63 = arith.truncf %62 : vector<2x8x8xf32> to vector<2x8x8xbf16>
    "tpu.trace_start"() <{level = 10 : i32, message = "bqk,bkd->bqd"}> : () -> ()
    %cst_24 = arith.constant dense<0.000000e+00> : vector<2x8x8xf32>
    %64 = tpu.matmul %63, %50, %cst_24 {dimension_numbers = #tpu.dot_dimension_numbers<[2], [1], [1], [2], [0, 0, 0, 1, 1, 2], [0], [0]>} : vector<2x8x8xbf16>, vector<2x8x8xbf16>, vector<2x8x8xf32> -> vector<2x8x8xf32>
    "tpu.trace_stop"() : () -> ()
    %65 = vector.extract_strided_slice %24 {offsets = [0, 0, 16], sizes = [2, 8, 8], strides = [1, 1, 1]} : vector<2x8x96xf32> to vector<2x8x8xf32>
    %66 = arith.truncf %65 : vector<2x8x8xf32> to vector<2x8x8xbf16>
    %67 = vector.extract_strided_slice %24 {offsets = [0, 0, 48], sizes = [2, 8, 8], strides = [1, 1, 1]} : vector<2x8x96xf32> to vector<2x8x8xf32>
    %68 = arith.truncf %67 : vector<2x8x8xf32> to vector<2x8x8xbf16>
    %69 = vector.extract_strided_slice %24 {offsets = [0, 0, 80], sizes = [2, 8, 8], strides = [1, 1, 1]} : vector<2x8x96xf32> to vector<2x8x8xf32>
    %70 = arith.truncf %69 : vector<2x8x8xf32> to vector<2x8x8xbf16>
    "tpu.trace_start"() <{level = 10 : i32, message = "bqd,bkd->bqk"}> : () -> ()
    %cst_25 = arith.constant dense<0.000000e+00> : vector<2x8x8xf32>
    %71 = tpu.matmul %66, %68, %cst_25 {dimension_numbers = #tpu.dot_dimension_numbers<[2], [2], [1], [1], [0, 0, 0, 1, 1, 1], [0], [0]>} : vector<2x8x8xbf16>, vector<2x8x8xbf16>, vector<2x8x8xf32> -> vector<2x8x8xf32>
    "tpu.trace_stop"() : () -> ()
    %72 = arith.addf %71, %15 : vector<2x8x8xf32>
    %cst_26 = arith.constant dense<0xFF800000> : vector<2x8xf32>
    %73 = vector.multi_reduction <maximumf>, %72, %cst_26 [2] : vector<2x8x8xf32> to vector<2x8xf32>
    %74 = vector.shape_cast %73 : vector<2x8xf32> to vector<2x8x1xf32>
    %75 = vector.broadcast %74 : vector<2x8x1xf32> to vector<2x8x8xf32>
    %76 = arith.subf %72, %75 : vector<2x8x8xf32>
    %77 = math.exp %76 : vector<2x8x8xf32>
    %cst_27 = arith.constant dense<0.000000e+00> : vector<2x8xf32>
    %78 = vector.multi_reduction <add>, %77, %cst_27 [2] : vector<2x8x8xf32> to vector<2x8xf32>
    %79 = vector.shape_cast %78 : vector<2x8xf32> to vector<2x8x1xf32>
    %80 = tpu.reciprocal %79 {approx = true} : vector<2x8x1xf32> -> vector<2x8x1xf32>
    %81 = vector.broadcast %80 : vector<2x8x1xf32> to vector<2x8x8xf32>
    %82 = arith.mulf %77, %81 : vector<2x8x8xf32>
    %83 = arith.truncf %82 : vector<2x8x8xf32> to vector<2x8x8xbf16>
    "tpu.trace_start"() <{level = 10 : i32, message = "bqk,bkd->bqd"}> : () -> ()
    %cst_28 = arith.constant dense<0.000000e+00> : vector<2x8x8xf32>
    %84 = tpu.matmul %83, %70, %cst_28 {dimension_numbers = #tpu.dot_dimension_numbers<[2], [1], [1], [2], [0, 0, 0, 1, 1, 2], [0], [0]>} : vector<2x8x8xbf16>, vector<2x8x8xbf16>, vector<2x8x8xf32> -> vector<2x8x8xf32>
    "tpu.trace_stop"() : () -> ()
    %85 = vector.extract_strided_slice %24 {offsets = [0, 0, 24], sizes = [2, 8, 8], strides = [1, 1, 1]} : vector<2x8x96xf32> to vector<2x8x8xf32>
    %86 = arith.truncf %85 : vector<2x8x8xf32> to vector<2x8x8xbf16>
    %87 = vector.extract_strided_slice %24 {offsets = [0, 0, 56], sizes = [2, 8, 8], strides = [1, 1, 1]} : vector<2x8x96xf32> to vector<2x8x8xf32>
    %88 = arith.truncf %87 : vector<2x8x8xf32> to vector<2x8x8xbf16>
    %89 = vector.extract_strided_slice %24 {offsets = [0, 0, 88], sizes = [2, 8, 8], strides = [1, 1, 1]} : vector<2x8x96xf32> to vector<2x8x8xf32>
    %90 = arith.truncf %89 : vector<2x8x8xf32> to vector<2x8x8xbf16>
    "tpu.trace_start"() <{level = 10 : i32, message = "bqd,bkd->bqk"}> : () -> ()
    %cst_29 = arith.constant dense<0.000000e+00> : vector<2x8x8xf32>
    %91 = tpu.matmul %86, %88, %cst_29 {dimension_numbers = #tpu.dot_dimension_numbers<[2], [2], [1], [1], [0, 0, 0, 1, 1, 1], [0], [0]>} : vector<2x8x8xbf16>, vector<2x8x8xbf16>, vector<2x8x8xf32> -> vector<2x8x8xf32>
    "tpu.trace_stop"() : () -> ()
    %92 = arith.addf %91, %15 : vector<2x8x8xf32>
    %cst_30 = arith.constant dense<0xFF800000> : vector<2x8xf32>
    %93 = vector.multi_reduction <maximumf>, %92, %cst_30 [2] : vector<2x8x8xf32> to vector<2x8xf32>
    %94 = vector.shape_cast %93 : vector<2x8xf32> to vector<2x8x1xf32>
    %95 = vector.broadcast %94 : vector<2x8x1xf32> to vector<2x8x8xf32>
    %96 = arith.subf %92, %95 : vector<2x8x8xf32>
    %97 = math.exp %96 : vector<2x8x8xf32>
    %cst_31 = arith.constant dense<0.000000e+00> : vector<2x8xf32>
    %98 = vector.multi_reduction <add>, %97, %cst_31 [2] : vector<2x8x8xf32> to vector<2x8xf32>
    %99 = vector.shape_cast %98 : vector<2x8xf32> to vector<2x8x1xf32>
    %100 = tpu.reciprocal %99 {approx = true} : vector<2x8x1xf32> -> vector<2x8x1xf32>
    %101 = vector.broadcast %100 : vector<2x8x1xf32> to vector<2x8x8xf32>
    %102 = arith.mulf %97, %101 : vector<2x8x8xf32>
    %103 = arith.truncf %102 : vector<2x8x8xf32> to vector<2x8x8xbf16>
    "tpu.trace_start"() <{level = 10 : i32, message = "bqk,bkd->bqd"}> : () -> ()
    %cst_32 = arith.constant dense<0.000000e+00> : vector<2x8x8xf32>
    %104 = tpu.matmul %103, %90, %cst_32 {dimension_numbers = #tpu.dot_dimension_numbers<[2], [1], [1], [2], [0, 0, 0, 1, 1, 2], [0], [0]>} : vector<2x8x8xbf16>, vector<2x8x8xbf16>, vector<2x8x8xf32> -> vector<2x8x8xf32>
    "tpu.trace_stop"() : () -> ()
    %105 = tpu.concatenate %44, %64, %84, %104 in 2 : vector<2x8x8xf32>, vector<2x8x8xf32>, vector<2x8x8xf32>, vector<2x8x8xf32> -> vector<2x8x32xf32>
    %106 = vector.shape_cast %105 : vector<2x8x32xf32> to vector<16x32xf32>
    %107 = arith.truncf %106 : vector<16x32xf32> to vector<16x32xbf16>
    %c0_33 = arith.constant 0 : index
    %c0_34 = arith.constant 0 : index
    %c0_35 = arith.constant 0 : index
    %108 = vector.load %arg7[%c0_33, %c0_34, %c0_35] : memref<2x32x32xbf16, #tpu.memory_space<vmem>>, vector<1x32x32xbf16>
    %109 = vector.shape_cast %108 : vector<1x32x32xbf16> to vector<32x32xbf16>
    %cst_36 = arith.constant dense<0.000000e+00> : vector<16x32xf32>
    %110 = tpu.matmul %107, %109, %cst_36 {dimension_numbers = #tpu.dot_dimension_numbers<[1], [0], [0], [1], [0, 0, 1, 1], [], []>} : vector<16x32xbf16>, vector<32x32xbf16>, vector<16x32xf32> -> vector<16x32xf32>
    %c0_37 = arith.constant 0 : index
    %c0_38 = arith.constant 0 : index
    %c0_39 = arith.constant 0 : index
    %111 = vector.load %arg8[%c0_37, %c0_38, %c0_39] : memref<2x1x32xf32, #tpu.memory_space<vmem>>, vector<1x1x32xf32>
    %112 = vector.shape_cast %111 : vector<1x1x32xf32> to vector<1x32xf32>
    %113 = vector.broadcast %112 : vector<1x32xf32> to vector<16x32xf32>
    %114 = arith.addf %110, %113 : vector<16x32xf32>
    %115 = arith.addf %12, %114 : vector<16x32xf32>
    %c0_40 = arith.constant 0 : index
    %c0_41 = arith.constant 0 : index
    %c0_42 = arith.constant 0 : index
    %116 = vector.load %arg9[%c0_40, %c0_41, %c0_42] : memref<2x1x32xf32, #tpu.memory_space<vmem>>, vector<1x1x32xf32>
    %117 = vector.shape_cast %116 : vector<1x1x32xf32> to vector<1x32xf32>
    %c0_43 = arith.constant 0 : index
    %c0_44 = arith.constant 0 : index
    %c0_45 = arith.constant 0 : index
    %118 = vector.load %arg10[%c0_43, %c0_44, %c0_45] : memref<2x1x32xf32, #tpu.memory_space<vmem>>, vector<1x1x32xf32>
    %119 = vector.shape_cast %118 : vector<1x1x32xf32> to vector<1x32xf32>
    %cst_46 = arith.constant dense<0.000000e+00> : vector<16xf32>
    %120 = vector.multi_reduction <add>, %115, %cst_46 [1] : vector<16x32xf32> to vector<16xf32>
    %121 = vector.shape_cast %120 : vector<16xf32> to vector<16x1xf32>
    %cst_47 = arith.constant 3.200000e+01 : f32
    %122 = vector.broadcast %cst_47 : f32 to vector<16x1xf32>
    %123 = arith.divf %121, %122 : vector<16x1xf32>
    %124 = vector.broadcast %123 : vector<16x1xf32> to vector<16x32xf32>
    %125 = arith.subf %115, %124 : vector<16x32xf32>
    %126 = arith.mulf %125, %125 : vector<16x32xf32>
    %cst_48 = arith.constant dense<0.000000e+00> : vector<16xf32>
    %127 = vector.multi_reduction <add>, %126, %cst_48 [1] : vector<16x32xf32> to vector<16xf32>
    %128 = vector.shape_cast %127 : vector<16xf32> to vector<16x1xf32>
    %cst_49 = arith.constant 3.200000e+01 : f32
    %129 = vector.broadcast %cst_49 : f32 to vector<16x1xf32>
    %130 = arith.divf %128, %129 : vector<16x1xf32>
    %cst_50 = arith.constant 9.99999996E-13 : f32
    %131 = vector.broadcast %cst_50 : f32 to vector<16x1xf32>
    %132 = arith.addf %130, %131 : vector<16x1xf32>
    %133 = math.rsqrt %132 : vector<16x1xf32>
    %134 = vector.broadcast %133 : vector<16x1xf32> to vector<16x32xf32>
    %135 = arith.mulf %125, %134 : vector<16x32xf32>
    %136 = vector.broadcast %117 : vector<1x32xf32> to vector<16x32xf32>
    %137 = arith.mulf %135, %136 : vector<16x32xf32>
    %138 = vector.broadcast %119 : vector<1x32xf32> to vector<16x32xf32>
    %139 = arith.addf %137, %138 : vector<16x32xf32>
    %140 = arith.truncf %139 : vector<16x32xf32> to vector<16x32xbf16>
    %c0_51 = arith.constant 0 : index
    %c0_52 = arith.constant 0 : index
    %c0_53 = arith.constant 0 : index
    %141 = vector.load %arg11[%c0_51, %c0_52, %c0_53] : memref<2x32x64xbf16, #tpu.memory_space<vmem>>, vector<1x32x64xbf16>
    %142 = vector.shape_cast %141 : vector<1x32x64xbf16> to vector<32x64xbf16>
    %cst_54 = arith.constant dense<0.000000e+00> : vector<16x64xf32>
    %143 = tpu.matmul %140, %142, %cst_54 {dimension_numbers = #tpu.dot_dimension_numbers<[1], [0], [0], [1], [0, 0, 1, 1], [], []>} : vector<16x32xbf16>, vector<32x64xbf16>, vector<16x64xf32> -> vector<16x64xf32>
    %c0_55 = arith.constant 0 : index
    %c0_56 = arith.constant 0 : index
    %c0_57 = arith.constant 0 : index
    %144 = vector.load %arg12[%c0_55, %c0_56, %c0_57] : memref<2x1x64xf32, #tpu.memory_space<vmem>>, vector<1x1x64xf32>
    %145 = vector.shape_cast %144 : vector<1x1x64xf32> to vector<1x64xf32>
    %146 = vector.broadcast %145 : vector<1x64xf32> to vector<16x64xf32>
    %147 = arith.addf %143, %146 : vector<16x64xf32>
    %148 = arith.mulf %147, %147 : vector<16x64xf32>
    %149 = arith.mulf %147, %148 : vector<16x64xf32>
    %cst_58 = arith.constant 4.471500e-02 : f32
    %150 = vector.broadcast %cst_58 : f32 to vector<16x64xf32>
    %151 = arith.mulf %150, %149 : vector<16x64xf32>
    %152 = arith.addf %147, %151 : vector<16x64xf32>
    %cst_59 = arith.constant 0.797884583 : f32
    %153 = vector.broadcast %cst_59 : f32 to vector<16x64xf32>
    %154 = arith.mulf %153, %152 : vector<16x64xf32>
    %155 = math.tanh %154 : vector<16x64xf32>
    %cst_60 = arith.constant 1.000000e+00 : f32
    %156 = vector.broadcast %cst_60 : f32 to vector<16x64xf32>
    %157 = arith.addf %156, %155 : vector<16x64xf32>
    %cst_61 = arith.constant 5.000000e-01 : f32
    %158 = vector.broadcast %cst_61 : f32 to vector<16x64xf32>
    %159 = arith.mulf %158, %157 : vector<16x64xf32>
    %160 = arith.mulf %147, %159 : vector<16x64xf32>
    %161 = arith.truncf %160 : vector<16x64xf32> to vector<16x64xbf16>
    %c0_62 = arith.constant 0 : index
    %c0_63 = arith.constant 0 : index
    %c0_64 = arith.constant 0 : index
    %162 = vector.load %arg13[%c0_62, %c0_63, %c0_64] : memref<2x64x32xbf16, #tpu.memory_space<vmem>>, vector<1x64x32xbf16>
    %163 = vector.shape_cast %162 : vector<1x64x32xbf16> to vector<64x32xbf16>
    %cst_65 = arith.constant dense<0.000000e+00> : vector<16x32xf32>
    %164 = tpu.matmul %161, %163, %cst_65 {dimension_numbers = #tpu.dot_dimension_numbers<[1], [0], [0], [1], [0, 0, 1, 1], [], []>} : vector<16x64xbf16>, vector<64x32xbf16>, vector<16x32xf32> -> vector<16x32xf32>
    %c0_66 = arith.constant 0 : index
    %c0_67 = arith.constant 0 : index
    %c0_68 = arith.constant 0 : index
    %165 = vector.load %arg14[%c0_66, %c0_67, %c0_68] : memref<2x1x32xf32, #tpu.memory_space<vmem>>, vector<1x1x32xf32>
    %166 = vector.shape_cast %165 : vector<1x1x32xf32> to vector<1x32xf32>
    %167 = vector.broadcast %166 : vector<1x32xf32> to vector<16x32xf32>
    %168 = arith.addf %164, %167 : vector<16x32xf32>
    %169 = arith.addf %139, %168 : vector<16x32xf32>
    %c0_69 = arith.constant 0 : index
    %c0_70 = arith.constant 0 : index
    %c0_71 = arith.constant 0 : index
    %170 = vector.load %arg15[%c0_69, %c0_70, %c0_71] : memref<2x1x32xf32, #tpu.memory_space<vmem>>, vector<1x1x32xf32>
    %171 = vector.shape_cast %170 : vector<1x1x32xf32> to vector<1x32xf32>
    %c0_72 = arith.constant 0 : index
    %c0_73 = arith.constant 0 : index
    %c0_74 = arith.constant 0 : index
    %172 = vector.load %arg16[%c0_72, %c0_73, %c0_74] : memref<2x1x32xf32, #tpu.memory_space<vmem>>, vector<1x1x32xf32>
    %173 = vector.shape_cast %172 : vector<1x1x32xf32> to vector<1x32xf32>
    %cst_75 = arith.constant dense<0.000000e+00> : vector<16xf32>
    %174 = vector.multi_reduction <add>, %169, %cst_75 [1] : vector<16x32xf32> to vector<16xf32>
    %175 = vector.shape_cast %174 : vector<16xf32> to vector<16x1xf32>
    %cst_76 = arith.constant 3.200000e+01 : f32
    %176 = vector.broadcast %cst_76 : f32 to vector<16x1xf32>
    %177 = arith.divf %175, %176 : vector<16x1xf32>
    %178 = vector.broadcast %177 : vector<16x1xf32> to vector<16x32xf32>
    %179 = arith.subf %169, %178 : vector<16x32xf32>
    %180 = arith.mulf %179, %179 : vector<16x32xf32>
    %cst_77 = arith.constant dense<0.000000e+00> : vector<16xf32>
    %181 = vector.multi_reduction <add>, %180, %cst_77 [1] : vector<16x32xf32> to vector<16xf32>
    %182 = vector.shape_cast %181 : vector<16xf32> to vector<16x1xf32>
    %cst_78 = arith.constant 3.200000e+01 : f32
    %183 = vector.broadcast %cst_78 : f32 to vector<16x1xf32>
    %184 = arith.divf %182, %183 : vector<16x1xf32>
    %cst_79 = arith.constant 9.99999996E-13 : f32
    %185 = vector.broadcast %cst_79 : f32 to vector<16x1xf32>
    %186 = arith.addf %184, %185 : vector<16x1xf32>
    %187 = math.rsqrt %186 : vector<16x1xf32>
    %188 = vector.broadcast %187 : vector<16x1xf32> to vector<16x32xf32>
    %189 = arith.mulf %179, %188 : vector<16x32xf32>
    %190 = vector.broadcast %171 : vector<1x32xf32> to vector<16x32xf32>
    %191 = arith.mulf %189, %190 : vector<16x32xf32>
    %192 = vector.broadcast %173 : vector<1x32xf32> to vector<16x32xf32>
    %193 = arith.addf %191, %192 : vector<16x32xf32>
    %194 = arith.truncf %193 : vector<16x32xf32> to vector<16x32xbf16>
    %c1 = arith.constant 1 : index
    %c0_80 = arith.constant 0 : index
    %c0_81 = arith.constant 0 : index
    %195 = vector.load %arg5[%c1, %c0_80, %c0_81] : memref<2x32x96xbf16, #tpu.memory_space<vmem>>, vector<1x32x96xbf16>
    %196 = vector.shape_cast %195 : vector<1x32x96xbf16> to vector<32x96xbf16>
    %cst_82 = arith.constant dense<0.000000e+00> : vector<16x96xf32>
    %197 = tpu.matmul %194, %196, %cst_82 {dimension_numbers = #tpu.dot_dimension_numbers<[1], [0], [0], [1], [0, 0, 1, 1], [], []>} : vector<16x32xbf16>, vector<32x96xbf16>, vector<16x96xf32> -> vector<16x96xf32>
    %c1_83 = arith.constant 1 : index
    %c0_84 = arith.constant 0 : index
    %c0_85 = arith.constant 0 : index
    %198 = vector.load %arg6[%c1_83, %c0_84, %c0_85] : memref<2x1x96xf32, #tpu.memory_space<vmem>>, vector<1x1x96xf32>
    %199 = vector.shape_cast %198 : vector<1x1x96xf32> to vector<1x96xf32>
    %200 = vector.broadcast %199 : vector<1x96xf32> to vector<16x96xf32>
    %201 = arith.addf %197, %200 : vector<16x96xf32>
    %202 = vector.shape_cast %201 : vector<16x96xf32> to vector<2x8x96xf32>
    %203 = vector.extract_strided_slice %202 {offsets = [0, 0, 0], sizes = [2, 8, 8], strides = [1, 1, 1]} : vector<2x8x96xf32> to vector<2x8x8xf32>
    %204 = arith.truncf %203 : vector<2x8x8xf32> to vector<2x8x8xbf16>
    %205 = vector.extract_strided_slice %202 {offsets = [0, 0, 32], sizes = [2, 8, 8], strides = [1, 1, 1]} : vector<2x8x96xf32> to vector<2x8x8xf32>
    %206 = arith.truncf %205 : vector<2x8x8xf32> to vector<2x8x8xbf16>
    %207 = vector.extract_strided_slice %202 {offsets = [0, 0, 64], sizes = [2, 8, 8], strides = [1, 1, 1]} : vector<2x8x96xf32> to vector<2x8x8xf32>
    %208 = arith.truncf %207 : vector<2x8x8xf32> to vector<2x8x8xbf16>
    "tpu.trace_start"() <{level = 10 : i32, message = "bqd,bkd->bqk"}> : () -> ()
    %cst_86 = arith.constant dense<0.000000e+00> : vector<2x8x8xf32>
    %209 = tpu.matmul %204, %206, %cst_86 {dimension_numbers = #tpu.dot_dimension_numbers<[2], [2], [1], [1], [0, 0, 0, 1, 1, 1], [0], [0]>} : vector<2x8x8xbf16>, vector<2x8x8xbf16>, vector<2x8x8xf32> -> vector<2x8x8xf32>
    "tpu.trace_stop"() : () -> ()
    %210 = arith.addf %209, %15 : vector<2x8x8xf32>
    %cst_87 = arith.constant dense<0xFF800000> : vector<2x8xf32>
    %211 = vector.multi_reduction <maximumf>, %210, %cst_87 [2] : vector<2x8x8xf32> to vector<2x8xf32>
    %212 = vector.shape_cast %211 : vector<2x8xf32> to vector<2x8x1xf32>
    %213 = vector.broadcast %212 : vector<2x8x1xf32> to vector<2x8x8xf32>
    %214 = arith.subf %210, %213 : vector<2x8x8xf32>
    %215 = math.exp %214 : vector<2x8x8xf32>
    %cst_88 = arith.constant dense<0.000000e+00> : vector<2x8xf32>
    %216 = vector.multi_reduction <add>, %215, %cst_88 [2] : vector<2x8x8xf32> to vector<2x8xf32>
    %217 = vector.shape_cast %216 : vector<2x8xf32> to vector<2x8x1xf32>
    %218 = tpu.reciprocal %217 {approx = true} : vector<2x8x1xf32> -> vector<2x8x1xf32>
    %219 = vector.broadcast %218 : vector<2x8x1xf32> to vector<2x8x8xf32>
    %220 = arith.mulf %215, %219 : vector<2x8x8xf32>
    %221 = arith.truncf %220 : vector<2x8x8xf32> to vector<2x8x8xbf16>
    "tpu.trace_start"() <{level = 10 : i32, message = "bqk,bkd->bqd"}> : () -> ()
    %cst_89 = arith.constant dense<0.000000e+00> : vector<2x8x8xf32>
    %222 = tpu.matmul %221, %208, %cst_89 {dimension_numbers = #tpu.dot_dimension_numbers<[2], [1], [1], [2], [0, 0, 0, 1, 1, 2], [0], [0]>} : vector<2x8x8xbf16>, vector<2x8x8xbf16>, vector<2x8x8xf32> -> vector<2x8x8xf32>
    "tpu.trace_stop"() : () -> ()
    %223 = vector.extract_strided_slice %202 {offsets = [0, 0, 8], sizes = [2, 8, 8], strides = [1, 1, 1]} : vector<2x8x96xf32> to vector<2x8x8xf32>
    %224 = arith.truncf %223 : vector<2x8x8xf32> to vector<2x8x8xbf16>
    %225 = vector.extract_strided_slice %202 {offsets = [0, 0, 40], sizes = [2, 8, 8], strides = [1, 1, 1]} : vector<2x8x96xf32> to vector<2x8x8xf32>
    %226 = arith.truncf %225 : vector<2x8x8xf32> to vector<2x8x8xbf16>
    %227 = vector.extract_strided_slice %202 {offsets = [0, 0, 72], sizes = [2, 8, 8], strides = [1, 1, 1]} : vector<2x8x96xf32> to vector<2x8x8xf32>
    %228 = arith.truncf %227 : vector<2x8x8xf32> to vector<2x8x8xbf16>
    "tpu.trace_start"() <{level = 10 : i32, message = "bqd,bkd->bqk"}> : () -> ()
    %cst_90 = arith.constant dense<0.000000e+00> : vector<2x8x8xf32>
    %229 = tpu.matmul %224, %226, %cst_90 {dimension_numbers = #tpu.dot_dimension_numbers<[2], [2], [1], [1], [0, 0, 0, 1, 1, 1], [0], [0]>} : vector<2x8x8xbf16>, vector<2x8x8xbf16>, vector<2x8x8xf32> -> vector<2x8x8xf32>
    "tpu.trace_stop"() : () -> ()
    %230 = arith.addf %229, %15 : vector<2x8x8xf32>
    %cst_91 = arith.constant dense<0xFF800000> : vector<2x8xf32>
    %231 = vector.multi_reduction <maximumf>, %230, %cst_91 [2] : vector<2x8x8xf32> to vector<2x8xf32>
    %232 = vector.shape_cast %231 : vector<2x8xf32> to vector<2x8x1xf32>
    %233 = vector.broadcast %232 : vector<2x8x1xf32> to vector<2x8x8xf32>
    %234 = arith.subf %230, %233 : vector<2x8x8xf32>
    %235 = math.exp %234 : vector<2x8x8xf32>
    %cst_92 = arith.constant dense<0.000000e+00> : vector<2x8xf32>
    %236 = vector.multi_reduction <add>, %235, %cst_92 [2] : vector<2x8x8xf32> to vector<2x8xf32>
    %237 = vector.shape_cast %236 : vector<2x8xf32> to vector<2x8x1xf32>
    %238 = tpu.reciprocal %237 {approx = true} : vector<2x8x1xf32> -> vector<2x8x1xf32>
    %239 = vector.broadcast %238 : vector<2x8x1xf32> to vector<2x8x8xf32>
    %240 = arith.mulf %235, %239 : vector<2x8x8xf32>
    %241 = arith.truncf %240 : vector<2x8x8xf32> to vector<2x8x8xbf16>
    "tpu.trace_start"() <{level = 10 : i32, message = "bqk,bkd->bqd"}> : () -> ()
    %cst_93 = arith.constant dense<0.000000e+00> : vector<2x8x8xf32>
    %242 = tpu.matmul %241, %228, %cst_93 {dimension_numbers = #tpu.dot_dimension_numbers<[2], [1], [1], [2], [0, 0, 0, 1, 1, 2], [0], [0]>} : vector<2x8x8xbf16>, vector<2x8x8xbf16>, vector<2x8x8xf32> -> vector<2x8x8xf32>
    "tpu.trace_stop"() : () -> ()
    %243 = vector.extract_strided_slice %202 {offsets = [0, 0, 16], sizes = [2, 8, 8], strides = [1, 1, 1]} : vector<2x8x96xf32> to vector<2x8x8xf32>
    %244 = arith.truncf %243 : vector<2x8x8xf32> to vector<2x8x8xbf16>
    %245 = vector.extract_strided_slice %202 {offsets = [0, 0, 48], sizes = [2, 8, 8], strides = [1, 1, 1]} : vector<2x8x96xf32> to vector<2x8x8xf32>
    %246 = arith.truncf %245 : vector<2x8x8xf32> to vector<2x8x8xbf16>
    %247 = vector.extract_strided_slice %202 {offsets = [0, 0, 80], sizes = [2, 8, 8], strides = [1, 1, 1]} : vector<2x8x96xf32> to vector<2x8x8xf32>
    %248 = arith.truncf %247 : vector<2x8x8xf32> to vector<2x8x8xbf16>
    "tpu.trace_start"() <{level = 10 : i32, message = "bqd,bkd->bqk"}> : () -> ()
    %cst_94 = arith.constant dense<0.000000e+00> : vector<2x8x8xf32>
    %249 = tpu.matmul %244, %246, %cst_94 {dimension_numbers = #tpu.dot_dimension_numbers<[2], [2], [1], [1], [0, 0, 0, 1, 1, 1], [0], [0]>} : vector<2x8x8xbf16>, vector<2x8x8xbf16>, vector<2x8x8xf32> -> vector<2x8x8xf32>
    "tpu.trace_stop"() : () -> ()
    %250 = arith.addf %249, %15 : vector<2x8x8xf32>
    %cst_95 = arith.constant dense<0xFF800000> : vector<2x8xf32>
    %251 = vector.multi_reduction <maximumf>, %250, %cst_95 [2] : vector<2x8x8xf32> to vector<2x8xf32>
    %252 = vector.shape_cast %251 : vector<2x8xf32> to vector<2x8x1xf32>
    %253 = vector.broadcast %252 : vector<2x8x1xf32> to vector<2x8x8xf32>
    %254 = arith.subf %250, %253 : vector<2x8x8xf32>
    %255 = math.exp %254 : vector<2x8x8xf32>
    %cst_96 = arith.constant dense<0.000000e+00> : vector<2x8xf32>
    %256 = vector.multi_reduction <add>, %255, %cst_96 [2] : vector<2x8x8xf32> to vector<2x8xf32>
    %257 = vector.shape_cast %256 : vector<2x8xf32> to vector<2x8x1xf32>
    %258 = tpu.reciprocal %257 {approx = true} : vector<2x8x1xf32> -> vector<2x8x1xf32>
    %259 = vector.broadcast %258 : vector<2x8x1xf32> to vector<2x8x8xf32>
    %260 = arith.mulf %255, %259 : vector<2x8x8xf32>
    %261 = arith.truncf %260 : vector<2x8x8xf32> to vector<2x8x8xbf16>
    "tpu.trace_start"() <{level = 10 : i32, message = "bqk,bkd->bqd"}> : () -> ()
    %cst_97 = arith.constant dense<0.000000e+00> : vector<2x8x8xf32>
    %262 = tpu.matmul %261, %248, %cst_97 {dimension_numbers = #tpu.dot_dimension_numbers<[2], [1], [1], [2], [0, 0, 0, 1, 1, 2], [0], [0]>} : vector<2x8x8xbf16>, vector<2x8x8xbf16>, vector<2x8x8xf32> -> vector<2x8x8xf32>
    "tpu.trace_stop"() : () -> ()
    %263 = vector.extract_strided_slice %202 {offsets = [0, 0, 24], sizes = [2, 8, 8], strides = [1, 1, 1]} : vector<2x8x96xf32> to vector<2x8x8xf32>
    %264 = arith.truncf %263 : vector<2x8x8xf32> to vector<2x8x8xbf16>
    %265 = vector.extract_strided_slice %202 {offsets = [0, 0, 56], sizes = [2, 8, 8], strides = [1, 1, 1]} : vector<2x8x96xf32> to vector<2x8x8xf32>
    %266 = arith.truncf %265 : vector<2x8x8xf32> to vector<2x8x8xbf16>
    %267 = vector.extract_strided_slice %202 {offsets = [0, 0, 88], sizes = [2, 8, 8], strides = [1, 1, 1]} : vector<2x8x96xf32> to vector<2x8x8xf32>
    %268 = arith.truncf %267 : vector<2x8x8xf32> to vector<2x8x8xbf16>
    "tpu.trace_start"() <{level = 10 : i32, message = "bqd,bkd->bqk"}> : () -> ()
    %cst_98 = arith.constant dense<0.000000e+00> : vector<2x8x8xf32>
    %269 = tpu.matmul %264, %266, %cst_98 {dimension_numbers = #tpu.dot_dimension_numbers<[2], [2], [1], [1], [0, 0, 0, 1, 1, 1], [0], [0]>} : vector<2x8x8xbf16>, vector<2x8x8xbf16>, vector<2x8x8xf32> -> vector<2x8x8xf32>
    "tpu.trace_stop"() : () -> ()
    %270 = arith.addf %269, %15 : vector<2x8x8xf32>
    %cst_99 = arith.constant dense<0xFF800000> : vector<2x8xf32>
    %271 = vector.multi_reduction <maximumf>, %270, %cst_99 [2] : vector<2x8x8xf32> to vector<2x8xf32>
    %272 = vector.shape_cast %271 : vector<2x8xf32> to vector<2x8x1xf32>
    %273 = vector.broadcast %272 : vector<2x8x1xf32> to vector<2x8x8xf32>
    %274 = arith.subf %270, %273 : vector<2x8x8xf32>
    %275 = math.exp %274 : vector<2x8x8xf32>
    %cst_100 = arith.constant dense<0.000000e+00> : vector<2x8xf32>
    %276 = vector.multi_reduction <add>, %275, %cst_100 [2] : vector<2x8x8xf32> to vector<2x8xf32>
    %277 = vector.shape_cast %276 : vector<2x8xf32> to vector<2x8x1xf32>
    %278 = tpu.reciprocal %277 {approx = true} : vector<2x8x1xf32> -> vector<2x8x1xf32>
    %279 = vector.broadcast %278 : vector<2x8x1xf32> to vector<2x8x8xf32>
    %280 = arith.mulf %275, %279 : vector<2x8x8xf32>
    %281 = arith.truncf %280 : vector<2x8x8xf32> to vector<2x8x8xbf16>
    "tpu.trace_start"() <{level = 10 : i32, message = "bqk,bkd->bqd"}> : () -> ()
    %cst_101 = arith.constant dense<0.000000e+00> : vector<2x8x8xf32>
    %282 = tpu.matmul %281, %268, %cst_101 {dimension_numbers = #tpu.dot_dimension_numbers<[2], [1], [1], [2], [0, 0, 0, 1, 1, 2], [0], [0]>} : vector<2x8x8xbf16>, vector<2x8x8xbf16>, vector<2x8x8xf32> -> vector<2x8x8xf32>
    "tpu.trace_stop"() : () -> ()
    %283 = tpu.concatenate %222, %242, %262, %282 in 2 : vector<2x8x8xf32>, vector<2x8x8xf32>, vector<2x8x8xf32>, vector<2x8x8xf32> -> vector<2x8x32xf32>
    %284 = vector.shape_cast %283 : vector<2x8x32xf32> to vector<16x32xf32>
    %285 = arith.truncf %284 : vector<16x32xf32> to vector<16x32xbf16>
    %c1_102 = arith.constant 1 : index
    %c0_103 = arith.constant 0 : index
    %c0_104 = arith.constant 0 : index
    %286 = vector.load %arg7[%c1_102, %c0_103, %c0_104] : memref<2x32x32xbf16, #tpu.memory_space<vmem>>, vector<1x32x32xbf16>
    %287 = vector.shape_cast %286 : vector<1x32x32xbf16> to vector<32x32xbf16>
    %cst_105 = arith.constant dense<0.000000e+00> : vector<16x32xf32>
    %288 = tpu.matmul %285, %287, %cst_105 {dimension_numbers = #tpu.dot_dimension_numbers<[1], [0], [0], [1], [0, 0, 1, 1], [], []>} : vector<16x32xbf16>, vector<32x32xbf16>, vector<16x32xf32> -> vector<16x32xf32>
    %c1_106 = arith.constant 1 : index
    %c0_107 = arith.constant 0 : index
    %c0_108 = arith.constant 0 : index
    %289 = vector.load %arg8[%c1_106, %c0_107, %c0_108] : memref<2x1x32xf32, #tpu.memory_space<vmem>>, vector<1x1x32xf32>
    %290 = vector.shape_cast %289 : vector<1x1x32xf32> to vector<1x32xf32>
    %291 = vector.broadcast %290 : vector<1x32xf32> to vector<16x32xf32>
    %292 = arith.addf %288, %291 : vector<16x32xf32>
    %293 = arith.addf %193, %292 : vector<16x32xf32>
    %c1_109 = arith.constant 1 : index
    %c0_110 = arith.constant 0 : index
    %c0_111 = arith.constant 0 : index
    %294 = vector.load %arg9[%c1_109, %c0_110, %c0_111] : memref<2x1x32xf32, #tpu.memory_space<vmem>>, vector<1x1x32xf32>
    %295 = vector.shape_cast %294 : vector<1x1x32xf32> to vector<1x32xf32>
    %c1_112 = arith.constant 1 : index
    %c0_113 = arith.constant 0 : index
    %c0_114 = arith.constant 0 : index
    %296 = vector.load %arg10[%c1_112, %c0_113, %c0_114] : memref<2x1x32xf32, #tpu.memory_space<vmem>>, vector<1x1x32xf32>
    %297 = vector.shape_cast %296 : vector<1x1x32xf32> to vector<1x32xf32>
    %cst_115 = arith.constant dense<0.000000e+00> : vector<16xf32>
    %298 = vector.multi_reduction <add>, %293, %cst_115 [1] : vector<16x32xf32> to vector<16xf32>
    %299 = vector.shape_cast %298 : vector<16xf32> to vector<16x1xf32>
    %cst_116 = arith.constant 3.200000e+01 : f32
    %300 = vector.broadcast %cst_116 : f32 to vector<16x1xf32>
    %301 = arith.divf %299, %300 : vector<16x1xf32>
    %302 = vector.broadcast %301 : vector<16x1xf32> to vector<16x32xf32>
    %303 = arith.subf %293, %302 : vector<16x32xf32>
    %304 = arith.mulf %303, %303 : vector<16x32xf32>
    %cst_117 = arith.constant dense<0.000000e+00> : vector<16xf32>
    %305 = vector.multi_reduction <add>, %304, %cst_117 [1] : vector<16x32xf32> to vector<16xf32>
    %306 = vector.shape_cast %305 : vector<16xf32> to vector<16x1xf32>
    %cst_118 = arith.constant 3.200000e+01 : f32
    %307 = vector.broadcast %cst_118 : f32 to vector<16x1xf32>
    %308 = arith.divf %306, %307 : vector<16x1xf32>
    %cst_119 = arith.constant 9.99999996E-13 : f32
    %309 = vector.broadcast %cst_119 : f32 to vector<16x1xf32>
    %310 = arith.addf %308, %309 : vector<16x1xf32>
    %311 = math.rsqrt %310 : vector<16x1xf32>
    %312 = vector.broadcast %311 : vector<16x1xf32> to vector<16x32xf32>
    %313 = arith.mulf %303, %312 : vector<16x32xf32>
    %314 = vector.broadcast %295 : vector<1x32xf32> to vector<16x32xf32>
    %315 = arith.mulf %313, %314 : vector<16x32xf32>
    %316 = vector.broadcast %297 : vector<1x32xf32> to vector<16x32xf32>
    %317 = arith.addf %315, %316 : vector<16x32xf32>
    %318 = arith.truncf %317 : vector<16x32xf32> to vector<16x32xbf16>
    %c1_120 = arith.constant 1 : index
    %c0_121 = arith.constant 0 : index
    %c0_122 = arith.constant 0 : index
    %319 = vector.load %arg11[%c1_120, %c0_121, %c0_122] : memref<2x32x64xbf16, #tpu.memory_space<vmem>>, vector<1x32x64xbf16>
    %320 = vector.shape_cast %319 : vector<1x32x64xbf16> to vector<32x64xbf16>
    %cst_123 = arith.constant dense<0.000000e+00> : vector<16x64xf32>
    %321 = tpu.matmul %318, %320, %cst_123 {dimension_numbers = #tpu.dot_dimension_numbers<[1], [0], [0], [1], [0, 0, 1, 1], [], []>} : vector<16x32xbf16>, vector<32x64xbf16>, vector<16x64xf32> -> vector<16x64xf32>
    %c1_124 = arith.constant 1 : index
    %c0_125 = arith.constant 0 : index
    %c0_126 = arith.constant 0 : index
    %322 = vector.load %arg12[%c1_124, %c0_125, %c0_126] : memref<2x1x64xf32, #tpu.memory_space<vmem>>, vector<1x1x64xf32>
    %323 = vector.shape_cast %322 : vector<1x1x64xf32> to vector<1x64xf32>
    %324 = vector.broadcast %323 : vector<1x64xf32> to vector<16x64xf32>
    %325 = arith.addf %321, %324 : vector<16x64xf32>
    %326 = arith.mulf %325, %325 : vector<16x64xf32>
    %327 = arith.mulf %325, %326 : vector<16x64xf32>
    %cst_127 = arith.constant 4.471500e-02 : f32
    %328 = vector.broadcast %cst_127 : f32 to vector<16x64xf32>
    %329 = arith.mulf %328, %327 : vector<16x64xf32>
    %330 = arith.addf %325, %329 : vector<16x64xf32>
    %cst_128 = arith.constant 0.797884583 : f32
    %331 = vector.broadcast %cst_128 : f32 to vector<16x64xf32>
    %332 = arith.mulf %331, %330 : vector<16x64xf32>
    %333 = math.tanh %332 : vector<16x64xf32>
    %cst_129 = arith.constant 1.000000e+00 : f32
    %334 = vector.broadcast %cst_129 : f32 to vector<16x64xf32>
    %335 = arith.addf %334, %333 : vector<16x64xf32>
    %cst_130 = arith.constant 5.000000e-01 : f32
    %336 = vector.broadcast %cst_130 : f32 to vector<16x64xf32>
    %337 = arith.mulf %336, %335 : vector<16x64xf32>
    %338 = arith.mulf %325, %337 : vector<16x64xf32>
    %339 = arith.truncf %338 : vector<16x64xf32> to vector<16x64xbf16>
    %c1_131 = arith.constant 1 : index
    %c0_132 = arith.constant 0 : index
    %c0_133 = arith.constant 0 : index
    %340 = vector.load %arg13[%c1_131, %c0_132, %c0_133] : memref<2x64x32xbf16, #tpu.memory_space<vmem>>, vector<1x64x32xbf16>
    %341 = vector.shape_cast %340 : vector<1x64x32xbf16> to vector<64x32xbf16>
    %cst_134 = arith.constant dense<0.000000e+00> : vector<16x32xf32>
    %342 = tpu.matmul %339, %341, %cst_134 {dimension_numbers = #tpu.dot_dimension_numbers<[1], [0], [0], [1], [0, 0, 1, 1], [], []>} : vector<16x64xbf16>, vector<64x32xbf16>, vector<16x32xf32> -> vector<16x32xf32>
    %c1_135 = arith.constant 1 : index
    %c0_136 = arith.constant 0 : index
    %c0_137 = arith.constant 0 : index
    %343 = vector.load %arg14[%c1_135, %c0_136, %c0_137] : memref<2x1x32xf32, #tpu.memory_space<vmem>>, vector<1x1x32xf32>
    %344 = vector.shape_cast %343 : vector<1x1x32xf32> to vector<1x32xf32>
    %345 = vector.broadcast %344 : vector<1x32xf32> to vector<16x32xf32>
    %346 = arith.addf %342, %345 : vector<16x32xf32>
    %347 = arith.addf %317, %346 : vector<16x32xf32>
    %c1_138 = arith.constant 1 : index
    %c0_139 = arith.constant 0 : index
    %c0_140 = arith.constant 0 : index
    %348 = vector.load %arg15[%c1_138, %c0_139, %c0_140] : memref<2x1x32xf32, #tpu.memory_space<vmem>>, vector<1x1x32xf32>
    %349 = vector.shape_cast %348 : vector<1x1x32xf32> to vector<1x32xf32>
    %c1_141 = arith.constant 1 : index
    %c0_142 = arith.constant 0 : index
    %c0_143 = arith.constant 0 : index
    %350 = vector.load %arg16[%c1_141, %c0_142, %c0_143] : memref<2x1x32xf32, #tpu.memory_space<vmem>>, vector<1x1x32xf32>
    %351 = vector.shape_cast %350 : vector<1x1x32xf32> to vector<1x32xf32>
    %cst_144 = arith.constant dense<0.000000e+00> : vector<16xf32>
    %352 = vector.multi_reduction <add>, %347, %cst_144 [1] : vector<16x32xf32> to vector<16xf32>
    %353 = vector.shape_cast %352 : vector<16xf32> to vector<16x1xf32>
    %cst_145 = arith.constant 3.200000e+01 : f32
    %354 = vector.broadcast %cst_145 : f32 to vector<16x1xf32>
    %355 = arith.divf %353, %354 : vector<16x1xf32>
    %356 = vector.broadcast %355 : vector<16x1xf32> to vector<16x32xf32>
    %357 = arith.subf %347, %356 : vector<16x32xf32>
    %358 = arith.mulf %357, %357 : vector<16x32xf32>
    %cst_146 = arith.constant dense<0.000000e+00> : vector<16xf32>
    %359 = vector.multi_reduction <add>, %358, %cst_146 [1] : vector<16x32xf32> to vector<16xf32>
    %360 = vector.shape_cast %359 : vector<16xf32> to vector<16x1xf32>
    %cst_147 = arith.constant 3.200000e+01 : f32
    %361 = vector.broadcast %cst_147 : f32 to vector<16x1xf32>
    %362 = arith.divf %360, %361 : vector<16x1xf32>
    %cst_148 = arith.constant 9.99999996E-13 : f32
    %363 = vector.broadcast %cst_148 : f32 to vector<16x1xf32>
    %364 = arith.addf %362, %363 : vector<16x1xf32>
    %365 = math.rsqrt %364 : vector<16x1xf32>
    %366 = vector.broadcast %365 : vector<16x1xf32> to vector<16x32xf32>
    %367 = arith.mulf %357, %366 : vector<16x32xf32>
    %368 = vector.broadcast %349 : vector<1x32xf32> to vector<16x32xf32>
    %369 = arith.mulf %367, %368 : vector<16x32xf32>
    %370 = vector.broadcast %351 : vector<1x32xf32> to vector<16x32xf32>
    %371 = arith.addf %369, %370 : vector<16x32xf32>
    %c0_149 = arith.constant 0 : index
    %c0_150 = arith.constant 0 : index
    %372 = vector.load %arg2[%c0_149, %c0_150] : memref<16x1xf32, #tpu.memory_space<vmem>>, vector<16x1xf32>
    %373 = vector.broadcast %372 : vector<16x1xf32> to vector<16x32xf32>
    %374 = arith.mulf %371, %373 : vector<16x32xf32>
    %375 = vector.shape_cast %374 : vector<16x32xf32> to vector<2x8x32xf32>
    %cst_151 = arith.constant dense<0.000000e+00> : vector<2x32xf32>
    %376 = vector.multi_reduction <add>, %375, %cst_151 [1] : vector<2x8x32xf32> to vector<2x32xf32>
    %377 = arith.mulf %376, %376 : vector<2x32xf32>
    %cst_152 = arith.constant dense<0.000000e+00> : vector<2xf32>
    %378 = vector.multi_reduction <add>, %377, %cst_152 [1] : vector<2x32xf32> to vector<2xf32>
    %379 = vector.shape_cast %378 : vector<2xf32> to vector<2x1xf32>
    %cst_153 = arith.constant 9.99999996E-13 : f32
    %380 = vector.broadcast %cst_153 : f32 to vector<2x1xf32>
    %381 = arith.addf %379, %380 : vector<2x1xf32>
    %382 = math.rsqrt %381 : vector<2x1xf32>
    %383 = vector.broadcast %382 : vector<2x1xf32> to vector<2x32xf32>
    %384 = arith.mulf %376, %383 : vector<2x32xf32>
    %c0_154 = arith.constant 0 : index
    %c0_155 = arith.constant 0 : index
    %385 = vector.load %arg17[%c0_154, %c0_155] : memref<2x32xf32, #tpu.memory_space<vmem>>, vector<2x32xf32>
    tpu.vector_store %arg17[%c0_154, %c0_155], %384 {strides = array<i32>} : memref<2x32xf32, #tpu.memory_space<vmem>>, vector<2x32xf32>,
    return
  }
}

</mosaic_0001>

<bundles_post_ra>
// kernel: encode.1
= control target key start
LH: loop header
LB: loop body
LE: loop exit
PB: predicated region body
PF: predicated region fallthrough
CT: control target
= control target key end

     0   :  { %s2822_s0 = inlined_call_operand.vmem [shape: s32[16,1], index: 0, kind: input, shape index: {}]   ;;  %s2823_s1 = inlined_call_operand.vmem [shape: f32[2,1,8], index: 1, kind: input, shape index: {}]   ;;  %s2824_s2 = inlined_call_operand.vmem [shape: f32[16,1], index: 2, kind: input, shape index: {}]   ;;  %s2825_s3 = inlined_call_operand.vmem [shape: bf16[128,32], index: 3, kind: input, shape index: {}]   ;;  %s2826_s4 = inlined_call_operand.vmem [shape: f32[8,32], index: 4, kind: input, shape index: {}]   ;;  %s2827_s5 = inlined_call_operand.vmem [shape: bf16[2,32,96], index: 5, kind: input, shape index: {}]   ;;  %s2828_s6 = inlined_call_operand.vmem [shape: f32[2,1,96], index: 6, kind: input, shape index: {}]   ;;  %s2829_s7 = inlined_call_operand.vmem [shape: bf16[2,32,32], index: 7, kind: input, shape index: {}]   ;;  %s2830_s8 = inlined_call_operand.vmem [shape: f32[2,1,32], index: 8, kind: input, shape index: {}]   ;;  %s2831_s9 = inlined_call_operand.vmem [shape: f32[2,1,32], index: 9, kind: input, shape index: {}]   ;;  %s2832_s10 = inlined_call_operand.vmem [shape: f32[2,1,32], index: 10, kind: input, shape index: {}]   ;;  %s2833_s11 = inlined_call_operand.vmem [shape: bf16[2,32,64], index: 11, kind: input, shape index: {}]   ;;  %s2834_s12 = inlined_call_operand.vmem [shape: f32[2,1,64], index: 12, kind: input, shape index: {}]   ;;  %s2835_s13 = inlined_call_operand.vmem [shape: bf16[2,64,32], index: 13, kind: input, shape index: {}]   ;;  %s2836_s14 = inlined_call_operand.vmem [shape: f32[2,1,32], index: 14, kind: input, shape index: {}]   ;;  %s2837_s15 = inlined_call_operand.vmem [shape: f32[2,1,32], index: 15, kind: input, shape index: {}]   ;;  %s2838_s16 = inlined_call_operand.vmem [shape: f32[2,1,32], index: 16, kind: input, shape index: {}]   ;;  %s2839_s17 = inlined_call_operand.hbm [shape: f32[2,32], index: 17, kind: output, shape index: {}]  }
   0x1   :  { %2855 = sst [smem:[#allocation5_spill]] %s2822_s0 }
   0x2   :  { %2856 = sst [smem:[#allocation6_spill]] %s2823_s1 }
   0x3   :  { %s2857_s26 = sld [smem:[#allocation5_spill]]  ;;  %v2020_v1 = vld [vmem:[%s2825_s3 + $0x38] sm:$0xff]  ;;  %v2228_v2 = vmov 0   ;;  %v2019_v3 = vld [vmem:[%s2825_s3 + $0x30] sm:$0xff]  ;;  %v2018_v4 = vld [vmem:[%s2825_s3 + $0x28] sm:$0xff] }
   0x4   :  { %2059 = vset.pattern.permute.xlu0 %v2228_v2  ;;  %2090 = vset.pattern.permute.xlu2 %v2228_v2 }
   0x5   :  { %138 = vmatpush.bf16.msra.mxu0 %v2020_v1 }
   0x9   :  { %v58_v0 = vld [vmem:[%s2857_s26] sm:$0xff]  ;;  %v59_v5 = vld [vmem:[%s2857_s26 + $0x8] sm:$0xff]  ;;  %139 = vmatpush.bf16.msra.mxu0 %v2019_v3 }
   0xa   :  { %63 = vperm.xlu0 %2059, %v58_v0  }
   0xb   :  { %22 = vsyncpa [#allocation3], 0  ;;  %v2017_v6 = vld [vmem:[%s2825_s3 + $0x20] sm:$0xff]  ;;  %v2016_v7 = vld [vmem:[%s2825_s3 + $0x18] sm:$0xff]  ;;  %v60_v12 = vlaneseq  ;;  %v2229_v15 = vmov 1.0|1.0  }
   0xc   :  { %v2015_v8 = vld [vmem:[%s2825_s3 + $0x10] sm:$0xff]  ;;  %v2014_v9 = vld [vmem:[%s2825_s3 + $0x8] sm:$0xff]  ;;  %v2013_v10 = vld [vmem:[%s2825_s3] sm:$0xff]  ;;  %vm181_vm3 = vcmask 261120   ;;  %s2231_s22 = smov 96   ;;  %s2232_s23 = smov 88  }
   0xd   :  { %140 = vmatpush.bf16.msra.mxu0 %v2018_v4  ;;  %v61_v13 = vand.u32 127, %v60_v12  ;;  %v2022_v16 = vld [vmem:[%s2827_s5 + $0x8] sm:$0xff]  ;;  %v2021_v17 = vld [vmem:[%s2827_s5] sm:$0xff]  ;;  %s2233_s24 = smov 120   ;;  %s2234_s25 = smov 112   ;;  %vm206_vm4 = vcmask 64512  }
   0xe   :  { %191 = vmatpush.bf16.msra.mxu1 %v2022_v16  ;;  %v89_v19 = vld [vmem:[%s2826_s4] sm:$0xff]  ;;  %s2851_s4 = smov 64   ;;  %s2235_s26 = smov 72   ;;  %vm279_vm5 = vcmask 1043456   ;;  %vm679_vm6 = vcmask 130048   ;;  %vm682_vm7 = vcmask 195584  }
   0xf   :  { %v2091_v24 = vld [vmem:[%s2828_s6] ss:$0 sm:$0xff]  ;;  %s2853_s27 = smov 104   ;;  %s2858_s0 = sld [smem:[#allocation6_spill]]  ;;  %vm881_vm15 = vcmask 523264  }
  0x10   :  { %s2237_s30 = smov 80   ;;  %s2849_s3 = smov 56  }
  0x11   :  { %141 = vmatpush.bf16.msra.mxu0 %v2017_v6  ;;  %s2847_s1 = smov 48   ;;  %s2843_s20 = smov 40  }
  0x12   :  { %66 = vperm.xlu0 %2059, %v59_v5   ;;  %192 = vmatpush.bf16.msra.mxu1 %v2021_v17  ;;  %s2842_s21 = smov 8   ;;  %s2846_s28 = smov 16  }
  0x13   :  { %s2845_s29 = smov 24  }
  0x15   :  { %142 = vmatpush.bf16.msra.mxu0 %v2016_v7  ;;  %v2422_v48 = vld [vmem:[%s2858_s0] ss:$0 sm:$0xff]  ;;  %v2440_v62 = vld [vmem:[%s2858_s0 + $0x1] ss:$0 sm:$0xff] }
  0x19   :  { %143 = vmatpush.bf16.msra.mxu0 %v2015_v8 }
  0x1d   :  { %144 = vmatpush.bf16.msra.mxu0 %v2014_v9 }
  0x21   :  { %145 = vmatpush.bf16.msra.mxu0 %v2013_v10 }
  0x7c   :  { %v64_v11 = vpop.permute.xlu0 %63 }
  0x7d   :  { %vm68_vm0 = vcmp.eq.s32.totalorder %v61_v13, %v64_v11 }
  0x84   :  { %v67_v14 = vpop.permute.xlu0 %66 }
  0x85   :  { %vm69_vm1 = vcmp.eq.s32.totalorder %v61_v13, %v67_v14 }
  0x86   :  { %vm1863_vm2 = vmpackc.low %vm69_vm1, %vm68_vm0 }
  0x87   :  { %1864 = vmatmul.msk.bf16.vlgmr.msra.gmra.mxu0 %vm1863_vm2, %v2229_v15 }
 0x104   :  { %v147_v18 = vpop.f32.mrf.mxu0 }
 0x105   :  { %v2375_v21 = vadd.f32 %v147_v18, %v89_v19 }
 0x10c   :  { %v149_v20 = vpop.f32.mrf.mxu0 }
 0x10d   :  { %v2377_v22 = vadd.f32 %v149_v20, %v89_v19 }
 0x10f   :  { %v160_v23 = vpack.c.bf16 %v2377_v22, %v2375_v21 }
 0x111   :  { %1873 = vmatmul.msk.bf16.vlgmr.msra.gmra.mxu1 %vm181_vm3, %v160_v23 }
 0x18e   :  { %v194_v25 = vpop.f32.mrf.mxu1 }
 0x18f   :  { %v195_v26 = vadd.f32 %v2091_v24, %v194_v25 }
 0x191   :  { %v199_v27 = vpack.c.bf16 %v195_v26, %v195_v26 }
 0x193   :  { %v202_v28 = vunpack.c.l.b16 %v199_v27 }
 0x195   :  { %v2385_v29 = vpack.c.b16 %v202_v28, %v202_v28 }
 0x196   :  { %v196_v30 = vpop.f32.mrf.mxu1 }
 0x197   :  { %v197_v31 = vadd.f32 %v2091_v24, %v196_v30  ;;  %274 = vrot.lane.b32.xlu0 %v2385_v29, %s2851_s4  ;;  %204 = vrot.lane.b32.xlu1 %v2385_v29, %s2231_s22 }
 0x199   :  { %v200_v32 = vpack.c.bf16 %v197_v31, %v197_v31 }
 0x19b   :  { %v227_v33 = vunpack.c.l.b16 %v200_v32 }
 0x19d   :  { %v2391_v34 = vpack.c.b16 %v227_v33, %v227_v33 }
 0x19f   :  { %229 = vrot.lane.b32.xlu2 %v2391_v34, %s2231_s22  ;;  %319 = vrot.lane.b32.xlu0 %v2385_v29, %s2232_s23 }
 0x1a7   :  { %342 = vrot.lane.b32.xlu0 %v2391_v34, %s2232_s23 }
 0x1af   :  { %317 = vrot.lane.b32.xlu0 %v2385_v29, %s2233_s24 }
 0x1b7   :  { %340 = vrot.lane.b32.xlu0 %v2391_v34, %s2233_s24 }
 0x1bf   :  { %429 = vrot.lane.b32.xlu0 %v2385_v29, %s2234_s25 }
 0x1c7   :  { %452 = vrot.lane.b32.xlu0 %v2391_v34, %s2234_s25 }
 0x1cf   :  { %543 = vrot.lane.b32.xlu0 %v2385_v29, %s2235_s26 }
 0x1d7   :  { %564 = vrot.lane.b32.xlu0 %v2391_v34, %s2853_s27 }
 0x1f9   :  { %v230_v35 = vpop.permute.xlu2 %229 }
 0x1fa   :  { %v235_v36 = vsel %vm206_vm4, %v230_v35, 0 }
 0x1fb   :  { %244 = vmatpush.bf16.xpose.msra.mxu3 %v235_v36 }
 0x202   :  { %1875 = vmatmul.msk.bf16.vlgmr.msra.gmra.mxu3 %vm206_vm4, %v200_v32 }
 0x209   :  { %v275_v37 = vpop.permute.xlu0 %274  ;;  %v205_v38 = vpop.permute.xlu1 %204 }
 0x20a   :  { %v211_v39 = vsel %vm206_vm4, %v205_v38, 0  ;;  %v281_v40 = vsel %vm279_vm5, %v275_v37, 0 }
 0x20b   :  { %220 = vmatpush.bf16.xpose.msra.mxu2 %v211_v39  ;;  %290 = vmatpush.bf16.msrb.mxu1 %v281_v40 }
 0x211   :  { %v320_v41 = vpop.permute.xlu0 %319 }
 0x212   :  { %1874 = vmatmul.msk.bf16.vlgmr.msra.gmra.mxu2 %vm206_vm4, %v199_v27  ;;  %v325_v42 = vsel %vm206_vm4, %v320_v41, 0 }
 0x213   :  { %334 = vmatpush.bf16.xpose.msrb.mxu3 %v325_v42 }
 0x219   :  { %v343_v43 = vpop.permute.xlu0 %342 }
 0x21a   :  { %v348_v44 = vsel %vm206_vm4, %v343_v43, 0 }
 0x21b   :  { %357 = vmatpush.bf16.xpose.msra.mxu1 %v348_v44 }
 0x221   :  { %v318_v45 = vpop.permute.xlu0 %317 }
 0x222   :  { %1878 = vmatmul.msk.bf16.vlgmr.msrb.gmra.mxu3 %vm206_vm4, %v318_v45 }
 0x229   :  { %v341_v1 = vpop.permute.xlu0 %340 }
 0x231   :  { %v430_v2 = vpop.permute.xlu0 %429 }
 0x239   :  { %v453_v3 = vpop.permute.xlu0 %452 }
 0x241   :  { %v544_v6 = vpop.permute.xlu0 %543 }
 0x242   :  { %v549_v11 = vsel %vm206_vm4, %v544_v6, 0 }
 0x249   :  { %v565_v17 = vpop.permute.xlu0 %564 }
 0x285   :  { %v246_v46 = vpop.f32.mrf.mxu3 }
 0x286   :  { %v247_v63 = vadd.f32 %v2440_v62, %v246_v46 }
 0x288   :  { %v253_v0 = vsel %vm206_vm4, %v247_v63, -inf }
 0x28d   :  { %v248_v47 = vpop.f32.mrf.mxu3 }
 0x295   :  { %v222_v49 = vpop.f32.mrf.mxu2 }
 0x296   :  { %v223_v50 = vadd.f32 %v2422_v48, %v222_v49 }
 0x298   :  { %v250_v51 = vsel %vm206_vm4, %v223_v50, -inf }
 0x299   :  { %251 = vmax.xlane.f32.xlu1 %v250_v51 }
 0x29d   :  { %v224_v52 = vpop.f32.mrf.mxu2 }
 0x2a5   :  { %v336_v53 = vpop.f32.mrf.mxu3 }
 0x2a6   :  { %v337_v55 = vadd.f32 %v2422_v48, %v336_v53 }
 0x2a8   :  { %v363_v56 = vsel %vm206_vm4, %v337_v55, -inf }
 0x2ad   :  { %v338_v54 = vpop.f32.mrf.mxu3 }
 0x2b2   :  { %454 = vrot.lane.b32.xlu1 %v2391_v34, %s2237_s30 }
 0x2ba   :  { %541 = vrot.lane.b32.xlu1 %v2385_v29, %s2853_s27  ;;  %s2865_s27 = smov 16  }
 0x2e4   :  { %364 = vmax.xlane.f32.xlu1 %v363_v56 }
 0x30c   :  { %v252_v57 = vpop.xlane.xlu1 %251 }
 0x30d   :  { %v256_v58 = vsub.f32 %v223_v50, %v252_v57 }
 0x30f   :  { %v258_v59 = vmul.f32 1.442695, %v256_v58 }
 0x311   :  { %2109 = vpow2.f32 %v258_v59 }
 0x317   :  { %v2110_v60 = vpop.eup %2109 }
 0x318   :  { %v262_v61 = vsel %vm206_vm4, %v2110_v60, 0.0 }
 0x319   :  { %263 = vadd.xlane.f32.xlu2 %v262_v61 }
 0x324   :  { %v455_v9 = vpop.permute.xlu1 %454 }
 0x325   :  { %v460_v13 = vsel %vm206_vm4, %v455_v9, 0 }
 0x32c   :  { %v542_v16 = vpop.permute.xlu1 %541 }
 0x331   :  { %431 = vrot.lane.b32.xlu2 %v2385_v29, %s2237_s30 }
 0x339   :  { %566 = vrot.lane.b32.xlu2 %v2391_v34, %s2235_s26 }
 0x357   :  { %v365_v25 = vpop.xlane.xlu1 %364 }
 0x358   :  { %v369_v26 = vsub.f32 %v337_v55, %v365_v25 }
 0x35a   :  { %v371_v28 = vmul.f32 1.442695, %v369_v26 }
 0x362   :  { %254 = vmax.xlane.f32.xlu2 %v253_v0 }
 0x38c   :  { %v264_v4 = vpop.xlane.xlu2 %263 }
 0x38d   :  { %2111 = vrcp.f32 %v264_v4 }
 0x393   :  { %v2112_v5 = vpop.eup %2111 }
 0x394   :  { %v270_v7 = vmul.f32 %v2112_v5, %v2110_v60  ;;  %v432_v8 = vpop.permute.xlu2 %431 }
 0x395   :  { %v437_v10 = vsel %vm206_vm4, %v432_v8, 0 }
 0x396   :  { %446 = vmatpush.bf16.xpose.msrb.mxu0 %v437_v10  ;;  %v272_v12 = vpack.c.bf16 %v270_v7, %v270_v7 }
 0x398   :  { %1876 = vmatmul.msk.bf16.vlgmr.msrb.gmra.mxu1 %vm206_vm4, %v272_v12 }
 0x399   :  { %469 = vmatpush.bf16.xpose.msrb.mxu1 %v460_v13 }
 0x39c   :  { %v567_v14 = vpop.permute.xlu2 %566 }
 0x39d   :  { %1882 = vmatmul.msk.bf16.vlgmr.msrb.gmra.mxu0 %vm206_vm4, %v430_v2  ;;  %v572_v15 = vsel %vm206_vm4, %v567_v14, 0 }
 0x39e   :  { %558 = vmatpush.bf16.xpose.msra.mxu0 %v549_v11 }
 0x3a8   :  { %1879 = vmatmul.msk.bf16.vlgmr.msra.gmra.mxu1 %vm206_vm4, %v341_v1 }
 0x3a9   :  { %581 = vmatpush.bf16.xpose.msra.mxu1 %v572_v15 }
 0x3ad   :  { %1886 = vmatmul.msk.bf16.vlgmr.msra.gmra.mxu0 %vm206_vm4, %v542_v16 }
 0x3b8   :  { %1883 = vmatmul.msk.bf16.vlgmr.msrb.gmra.mxu1 %vm206_vm4, %v453_v3 }
 0x3c8   :  { %1887 = vmatmul.msk.bf16.vlgmr.msra.gmra.mxu1 %vm206_vm4, %v565_v17 }
 0x3d5   :  { %v255_v18 = vpop.xlane.xlu2 %254 }
 0x3d6   :  { %v257_v19 = vsub.f32 %v247_v63, %v255_v18 }
 0x3d8   :  { %v260_v20 = vmul.f32 1.442695, %v257_v19 }
 0x3da   :  { %2113 = vpow2.f32 %v260_v20 }
 0x3db   :  { %2115 = vpow2.f32 %v371_v28 }
 0x3e0   :  { %v2454_v23 = vpop.eup %2113 }
 0x3e1   :  { %v265_v24 = vsel %vm206_vm4, %v2454_v23, 0.0  ;;  %v2462_v35 = vpop.eup %2115 }
 0x3e2   :  { %266 = vadd.xlane.f32.xlu1 %v265_v24  ;;  %v375_v38 = vsel %vm206_vm4, %v2462_v35, 0.0 }
 0x415   :  { %v2458_v27 = vpop.f32.mrf.mxu1 }
 0x41a   :  { %v448_v30 = vpop.f32.mrf.mxu0 }
 0x41b   :  { %v449_v31 = vadd.f32 %v2422_v48, %v448_v30 }
 0x41d   :  { %v294_v32 = vpop.f32.mrf.mxu1  ;;  %v475_v33 = vsel %vm206_vm4, %v449_v31, -inf }
 0x41e   :  { %476 = vmax.xlane.f32.xlu2 %v475_v33 }
 0x422   :  { %v450_v36 = vpop.f32.mrf.mxu0 }
 0x425   :  { %v359_v37 = vpop.f32.mrf.mxu1 }
 0x426   :  { %376 = vadd.xlane.f32.xlu2 %v375_v38  ;;  %v360_v43 = vadd.f32 %v2440_v62, %v359_v37 }
 0x428   :  { %v366_v46 = vsel %vm206_vm4, %v360_v43, -inf }
 0x42a   :  { %v560_v39 = vpop.f32.mrf.mxu0 }
 0x42b   :  { %v2467_v40 = vadd.f32 %v2422_v48, %v560_v39 }
 0x42d   :  { %v361_v41 = vpop.f32.mrf.mxu1  ;;  %v587_v42 = vsel %vm206_vm4, %v2467_v40, -inf }
 0x42e   :  { %588 = vmax.xlane.f32.xlu0 %v587_v42 }
 0x432   :  { %v562_v44 = vpop.f32.mrf.mxu0 }
 0x435   :  { %v471_v45 = vpop.f32.mrf.mxu1 }
 0x436   :  { %v472_v47 = vadd.f32 %v2440_v62, %v471_v45  ;;  %367 = vmax.xlane.f32.xlu0 %v366_v46 }
 0x438   :  { %v478_v49 = vsel %vm206_vm4, %v472_v47, -inf }
 0x439   :  { %479 = vmax.xlane.f32.xlu1 %v478_v49 }
 0x43d   :  { %v473_v50 = vpop.f32.mrf.mxu1 }
 0x445   :  { %v583_v51 = vpop.f32.mrf.mxu1 }
 0x446   :  { %v584_v52 = vadd.f32 %v2440_v62, %v583_v51 }
 0x448   :  { %v590_v53 = vsel %vm206_vm4, %v584_v52, -inf }
 0x449   :  { %591 = vmax.xlane.f32.xlu2 %v590_v53 }
 0x44a   :  { %296 = vrot.lane.b32.xlu0 %v2391_v34, %s2851_s4 }
 0x44d   :  { %v585_v54 = vpop.f32.mrf.mxu1 }
 0x452   :  { %408 = vrot.lane.b32.xlu1 %v2391_v34, %s2849_s3 }
 0x455   :  { %v267_v61 = vpop.xlane.xlu1 %266 }
 0x45a   :  { %499 = vrot.lane.b32.xlu1 %v2385_v29, %s2847_s1 }
 0x461   :  { %387 = vrot.lane.b32.xlu2 %v2385_v29, %s2849_s3  ;;  %s2866_s3 = smov 24  }
 0x491   :  { %v477_v55 = vpop.xlane.xlu2 %476 }
 0x492   :  { %v481_v56 = vsub.f32 %v449_v31, %v477_v55 }
 0x494   :  { %v483_v57 = vmul.f32 1.442695, %v481_v56 }
 0x496   :  { %2117 = vpow2.f32 %v483_v57 }
 0x499   :  { %v377_v6 = vpop.xlane.xlu2 %376 }
 0x49c   :  { %v2118_v58 = vpop.eup %2117 }
 0x49d   :  { %v487_v59 = vsel %vm206_vm4, %v2118_v58, 0.0 }
 0x49e   :  { %488 = vadd.xlane.f32.xlu0 %v487_v59 }
 0x4a1   :  { %v589_v60 = vpop.xlane.xlu0 %588 }
 0x4a2   :  { %v593_v33 = vsub.f32 %v2467_v40, %v589_v60 }
 0x4a9   :  { %v368_v63 = vpop.xlane.xlu0 %367 }
 0x4aa   :  { %v370_v0 = vsub.f32 %v360_v43, %v368_v63 }
 0x4ac   :  { %v373_v1 = vmul.f32 1.442695, %v370_v0  ;;  %v480_v2 = vpop.xlane.xlu1 %479 }
 0x4ad   :  { %v482_v3 = vsub.f32 %v472_v47, %v480_v2 }
 0x4ae   :  { %2119 = vpow2.f32 %v373_v1 }
 0x4af   :  { %v485_v4 = vmul.f32 1.442695, %v482_v3 }
 0x4b1   :  { %2121 = vpow2.f32 %v485_v4 }
 0x4b2   :  { %2123 = vrcp.f32 %v267_v61 }
 0x4b4   :  { %v2120_v5 = vpop.eup %2119 }
 0x4b5   :  { %v378_v7 = vsel %vm206_vm4, %v2120_v5, 0.0 }
 0x4b6   :  { %379 = vadd.xlane.f32.xlu1 %v378_v7 }
 0x4b7   :  { %v2122_v8 = vpop.eup %2121 }
 0x4b8   :  { %v2124_v9 = vpop.eup %2123  ;;  %v490_v10 = vsel %vm206_vm4, %v2122_v8, 0.0 }
 0x4b9   :  { %491 = vadd.xlane.f32.xlu2 %v490_v10  ;;  %v271_v11 = vmul.f32 %v2124_v9, %v2454_v23 }
 0x4bb   :  { %v273_v17 = vpack.c.bf16 %v271_v11, %v271_v11 }
 0x4bc   :  { %v297_v12 = vpop.permute.xlu0 %296  ;;  %v592_v13 = vpop.xlane.xlu2 %591 }
 0x4bd   :  { %v594_v14 = vsub.f32 %v584_v52, %v592_v13  ;;  %v302_v15 = vsel %vm279_vm5, %v297_v12, 0 }
 0x4be   :  { %311 = vmatpush.bf16.msrb.mxu2 %v302_v15 }
 0x4bf   :  { %v597_v16 = vmul.f32 1.442695, %v594_v14 }
 0x4c1   :  { %2125 = vpow2.f32 %v597_v16  ;;  %1877 = vmatmul.msk.bf16.vlgmr.msrb.gmra.mxu2 %vm206_vm4, %v273_v17  ;;  %v2024_v17 = vld [vmem:[%s2829_s7 + $0x8] sm:$0xff] }
 0x4c2   :  { %2127 = vrcp.f32 %v377_v6  ;;  %715 = vmatpush.bf16.msrb.mxu0 %v2024_v17 }
 0x4c4   :  { %v388_v18 = vpop.permute.xlu2 %387  ;;  %v409_v19 = vpop.permute.xlu1 %408 }
 0x4c5   :  { %v393_v20 = vsel %vm279_vm5, %v388_v18, 0  ;;  %v414_v24 = vsel %vm279_vm5, %v409_v19, 0  ;;  %v2023_v18 = vld [vmem:[%s2829_s7] sm:$0xff] }
 0x4c6   :  { %402 = vmatpush.bf16.msra.mxu2 %v393_v20  ;;  %423 = vmatpush.bf16.msra.mxu3 %v414_v24 }
 0x4c7   :  { %v2126_v23 = vpop.eup %2125  ;;  %716 = vmatpush.bf16.msrb.mxu0 %v2023_v18 }
 0x4c8   :  { %v2128_v25 = vpop.eup %2127  ;;  %v602_v26 = vsel %vm206_vm4, %v2126_v23, 0.0 }
 0x4c9   :  { %603 = vadd.xlane.f32.xlu0 %v602_v26  ;;  %v383_v28 = vmul.f32 %v2128_v25, %v2462_v35  ;;  %v595_v35 = vmul.f32 1.442695, %v593_v33 }
 0x4cb   :  { %v385_v32 = vpack.c.bf16 %v383_v28, %v383_v28  ;;  %2129 = vpow2.f32 %v595_v35 }
 0x4cc   :  { %v500_v30 = vpop.permute.xlu1 %499 }
 0x4cd   :  { %v505_v31 = vsel %vm279_vm5, %v500_v30, 0 }
 0x4ce   :  { %514 = vmatpush.bf16.msrb.mxu2 %v505_v31 }
 0x4cf   :  { %520 = vrot.lane.b32.xlu1 %v2391_v34, %s2847_s1 }
 0x4d1   :  { %1880 = vmatmul.msk.bf16.vlgmr.msra.gmra.mxu2 %vm206_vm4, %v385_v32  ;;  %632 = vrot.lane.b32.xlu2 %v2391_v34, %s2843_s20  ;;  %v2130_v36 = vpop.eup %2129 }
 0x4d2   :  { %v599_v37 = vsel %vm206_vm4, %v2130_v36, 0.0 }
 0x4dd   :  { %611 = vrot.lane.b32.xlu0 %v2385_v29, %s2843_s20 }
 0x4f9   :  { %600 = vadd.xlane.f32.xlu1 %v599_v37 }
 0x511   :  { %v489_v38 = vpop.xlane.xlu0 %488 }
 0x512   :  { %2131 = vrcp.f32 %v489_v38 }
 0x518   :  { %v2132_v39 = vpop.eup %2131 }
 0x519   :  { %v495_v41 = vmul.f32 %v2132_v39, %v2118_v58 }
 0x51b   :  { %v497_v42 = vpack.c.bf16 %v495_v41, %v495_v41  ;;  %v2094_v41 = vld [vmem:[%s2830_s8] ss:$0 sm:$0xff] }
 0x51d   :  { %1884 = vmatmul.msk.bf16.vlgmr.msrb.gmra.mxu2 %vm206_vm4, %v497_v42 }
 0x529   :  { %v380_v43 = vpop.xlane.xlu1 %379 }
 0x52a   :  { %2133 = vrcp.f32 %v380_v43 }
 0x52c   :  { %v492_v45 = vpop.xlane.xlu2 %491 }
 0x52d   :  { %2135 = vrcp.f32 %v492_v45 }
 0x530   :  { %v2134_v34 = vpop.eup %2133 }
 0x531   :  { %v384_v44 = vmul.f32 %v2134_v34, %v2120_v5 }
 0x533   :  { %v386_v29 = vpack.c.bf16 %v384_v44, %v384_v44  ;;  %v2136_v40 = vpop.eup %2135 }
 0x534   :  { %v496_v46 = vmul.f32 %v2136_v40, %v2122_v8  ;;  %v633_v47 = vpop.permute.xlu2 %632 }
 0x535   :  { %1881 = vmatmul.msk.bf16.vlgmr.msra.gmra.mxu3 %vm206_vm4, %v386_v29  ;;  %v638_v51 = vsel %vm279_vm5, %v633_v47, 0 }
 0x536   :  { %v498_v52 = vpack.c.bf16 %v496_v46, %v496_v46  ;;  %v2244_v46 = vmov 32.0  }
 0x53c   :  { %v604_v53 = vpop.xlane.xlu0 %603 }
 0x53d   :  { %2137 = vrcp.f32 %v604_v53 }
 0x541   :  { %v521_v49 = vpop.permute.xlu1 %520 }
 0x542   :  { %v526_v50 = vsel %vm279_vm5, %v521_v49, 0 }
 0x543   :  { %535 = vmatpush.bf16.msrb.mxu3 %v526_v50  ;;  %v2138_v56 = vpop.eup %2137 }
 0x544   :  { %v313_v54 = vpop.f32.mrf.mxu2  ;;  %v608_v58 = vmul.f32 %v2138_v56, %v2126_v23 }
 0x546   :  { %1885 = vmatmul.msk.bf16.vlgmr.msrb.gmra.mxu3 %vm206_vm4, %v498_v52  ;;  %v610_v60 = vpack.c.bf16 %v608_v58, %v608_v58 }
 0x547   :  { %647 = vmatpush.bf16.msra.mxu3 %v638_v51 }
 0x54c   :  { %v315_v55 = vpop.f32.mrf.mxu2 }
 0x54f   :  { %v612_v57 = vpop.permute.xlu0 %611 }
 0x550   :  { %v617_v59 = vsel %vm279_vm5, %v612_v57, 0 }
 0x551   :  { %626 = vmatpush.bf16.msra.mxu2 %v617_v59 }
 0x554   :  { %v404_v61 = vpop.f32.mrf.mxu2 }
 0x556   :  { %1889 = vmatmul.msk.bf16.vlgmr.msra.gmra.mxu3 %vm206_vm4, %v610_v60 }
 0x55c   :  { %v406_v63 = vpop.f32.mrf.mxu2 }
 0x55d   :  { %v2026_v63 = vld [vmem:[%s2833_s11 + $0x8] sm:$0xff] }
 0x55e   :  { %818 = vmatpush.bf16.msrb.mxu1 %v2026_v63 }
 0x56c   :  { %v601_v0 = vpop.xlane.xlu1 %600 }
 0x56d   :  { %2139 = vrcp.f32 %v601_v0 }
 0x56e   :  { %2141 = vrcp.f32 %v2244_v46 }
 0x573   :  { %v2140_v1 = vpop.eup %2139 }
 0x574   :  { %v607_v2 = vmul.f32 %v2140_v1, %v2130_v36  ;;  %v2142_v47 = vpop.eup %2141 }
 0x575   :  { %v734_v49 = vmul.f32 32.0, %v2142_v47  ;;  %vm738_vm8 = vweird.f32 %v2142_v47 }
 0x576   :  { %v609_v3 = vpack.c.bf16 %v607_v2, %v607_v2 }
 0x577   :  { %v735_v50 = vsub.f32 1.0, %v734_v49 }
 0x578   :  { %1888 = vmatmul.msk.bf16.vlgmr.msra.gmra.mxu2 %vm206_vm4, %v609_v3  ;;  %v2025_v3 = vld [vmem:[%s2833_s11] sm:$0xff] }
 0x579   :  { %v736_v51 = vmul.f32 %v2142_v47, %v735_v50  ;;  %819 = vmatpush.bf16.msrb.mxu1 %v2025_v3 }
 0x57b   :  { %v737_v52 = vadd.f32 %v2142_v47, %v736_v51 }
 0x57d   :  { %v2537_v53 = vsel %vm738_vm8, %v2142_v47, %v737_v52 }
 0x5a0   :  { %v516_v4 = vpop.f32.mrf.mxu2 }
 0x5a8   :  { %v518_v5 = vpop.f32.mrf.mxu2 }
 0x5b8   :  { %v425_v6 = vpop.f32.mrf.mxu3 }
 0x5b9   :  { %v2060_v7 = vpack.i.bf16 %v425_v6, %v404_v61 }
 0x5bb   :  { %2061 = vrot.lane.b32.xlu0 %v2060_v7, %s2842_s21 }
 0x5c0   :  { %v427_v8 = vpop.f32.mrf.mxu3 }
 0x5c9   :  { %v537_v9 = vpop.f32.mrf.mxu3 }
 0x5ca   :  { %v2065_v10 = vpack.i.bf16 %v537_v9, %v516_v4 }
 0x5cc   :  { %2066 = vrot.lane.b32.xlu1 %v2065_v10, %s2846_s28 }
 0x5d1   :  { %v539_v11 = vpop.f32.mrf.mxu3 }
 0x5d9   :  { %v649_v12 = vpop.f32.mrf.mxu3 }
 0x5e1   :  { %v651_v13 = vpop.f32.mrf.mxu3 }
 0x5fb   :  { %v628_v14 = vpop.f32.mrf.mxu2 }
 0x5fc   :  { %v2070_v15 = vpack.i.bf16 %v649_v12, %v628_v14 }
 0x5fe   :  { %2071 = vrot.lane.b32.xlu2 %v2070_v15, %s2845_s29 }
 0x603   :  { %v630_v16 = vpop.f32.mrf.mxu2 }
 0x62d   :  { %v2062_v19 = vpop.permute.xlu0 %2061 }
 0x62e   :  { %v2064_v24 = vunpack.i.h.bf16 %v2062_v19  ;;  %v2063_v23 = vunpack.i.l.bf16 %v2062_v19  ;;  %v2095_v19 = vld [vmem:[%s2831_s9] ss:$0 sm:$0xff] }
 0x630   :  { %v678_v30 = vsel %vm206_vm4, %v313_v54, %v2064_v24  ;;  %v677_v31 = vsel %vm206_vm4, %v2458_v27, %v2063_v23 }
 0x63e   :  { %v2067_v20 = vpop.permute.xlu1 %2066 }
 0x63f   :  { %v2069_v25 = vunpack.i.h.bf16 %v2067_v20  ;;  %v2068_v26 = vunpack.i.l.bf16 %v2067_v20 }
 0x641   :  { %v681_v35 = vsel %vm679_vm6, %v678_v30, %v2069_v25  ;;  %v680_v36 = vsel %vm679_vm6, %v677_v31, %v2068_v26  ;;  %v2096_v25 = vld [vmem:[%s2832_s10] ss:$0 sm:$0xff] }
 0x658   :  { %v2072_v28 = vpop.permute.xlu2 %2071 }
 0x659   :  { %v2074_v32 = vunpack.i.h.bf16 %v2072_v28  ;;  %v2073_v33 = vunpack.i.l.bf16 %v2072_v28 }
 0x65b   :  { %v683_v37 = vsel %vm682_vm7, %v680_v36, %v2073_v33  ;;  %v684_v38 = vsel %vm682_vm7, %v681_v35, %v2074_v32  ;;  %v2030_v35 = vld [vmem:[%s2835_s13 + $0x18] sm:$0xff]  ;;  %v2029_v36 = vld [vmem:[%s2835_s13 + $0x10] sm:$0xff] }
 0x65c   :  { %v685_v39 = vpack.c.bf16 %v684_v38, %v683_v37  ;;  %889 = vmatpush.bf16.msrb.mxu2 %v2030_v35  ;;  %v2028_v37 = vld [vmem:[%s2835_s13 + $0x8] sm:$0xff]  ;;  %v2097_v38 = vld [vmem:[%s2834_s12] ss:$0 sm:$0xff] }
 0x65e   :  { %1898 = vmatmul.msk.bf16.vlgmr.msrb.gmra.mxu0 %vm181_vm3, %v685_v39 }
 0x660   :  { %890 = vmatpush.bf16.msrb.mxu2 %v2029_v36 }
 0x664   :  { %891 = vmatpush.bf16.msrb.mxu2 %v2028_v37 }
 0x6db   :  { %v718_v42 = vpop.f32.mrf.mxu0 }
 0x6dc   :  { %v719_v43 = vadd.f32 %v2094_v41, %v718_v42 }
 0x6de   :  { %v723_v27 = vadd.f32 %v719_v43, %v2375_v21 }
 0x6e0   :  { %v727_v34 = vsel %vm181_vm3, %v723_v27, 0.0 }
 0x6e1   :  { %728 = vadd.xlane.f32.xlu0 %v727_v34 }
 0x6e3   :  { %v720_v44 = vpop.f32.mrf.mxu0 }
 0x6e4   :  { %v721_v29 = vadd.f32 %v2094_v41, %v720_v44  ;;  %v2027_v41 = vld [vmem:[%s2835_s13] sm:$0xff] }
 0x6e5   :  { %892 = vmatpush.bf16.msrb.mxu2 %v2027_v41 }
 0x6e6   :  { %v724_v45 = vadd.f32 %v721_v29, %v2377_v22 }
 0x6e8   :  { %v730_v40 = vsel %vm181_vm3, %v724_v45, 0.0 }
 0x6e9   :  { %731 = vadd.xlane.f32.xlu2 %v730_v40 }
 0x754   :  { %v729_v21 = vpop.xlane.xlu0 %728 }
 0x755   :  { %v740_v54 = vmul.f32 %v2537_v53, %v729_v21 }
 0x757   :  { %v742_v55 = vsub.f32 %v723_v27, %v740_v54 }
 0x759   :  { %v744_v56 = vmul.f32 %v742_v55, %v742_v55 }
 0x75b   :  { %v746_v22 = vsel %vm181_vm3, %v744_v56, 0.0 }
 0x75c   :  { %v732_v57 = vpop.xlane.xlu2 %731  ;;  %747 = vadd.xlane.f32.xlu1 %v746_v22 }
 0x75d   :  { %v741_v58 = vmul.f32 %v2537_v53, %v732_v57 }
 0x75f   :  { %v743_v59 = vsub.f32 %v724_v45, %v741_v58 }
 0x761   :  { %v745_v60 = vmul.f32 %v743_v59, %v743_v59 }
 0x763   :  { %v749_v61 = vsel %vm181_vm3, %v745_v60, 0.0  ;;  %v2098_v60 = vld [vmem:[%s2836_s14] ss:$0 sm:$0xff] }
 0x764   :  { %750 = vadd.xlane.f32.xlu0 %v749_v61 }
 0x7cf   :  { %v748_v0 = vpop.xlane.xlu1 %747 }
 0x7d0   :  { %v752_v1 = vmul.f32 %v748_v0, %v2537_v53 }
 0x7d2   :  { %v754_v2 = vadd.f32 1e-12, %v752_v1 }
 0x7d4   :  { %2143 = vrsqrt.f32 %v754_v2  ;;  %vm762_vm10 = vweird.f32 %v754_v2 }
 0x7d7   :  { %v751_v4 = vpop.xlane.xlu0 %750 }
 0x7d8   :  { %v753_v5 = vmul.f32 %v751_v4, %v2537_v53 }
 0x7da   :  { %v2144_v6 = vpop.eup %2143  ;;  %v755_v7 = vadd.f32 1e-12, %v753_v5 }
 0x7db   :  { %v757_v8 = vmul.f32 %v2144_v6, %v754_v2  ;;  %vm763_vm9 = vweird.f32 %v2144_v6 }
 0x7dc   :  { %2145 = vrsqrt.f32 %v755_v7  ;;  %vm764_vm11 = vmor %vm762_vm10, %vm763_vm9  ;;  %vm772_vm13 = vweird.f32 %v755_v7 }
 0x7dd   :  { %v758_v9 = vmul.f32 %v2144_v6, %v757_v8 }
 0x7df   :  { %v759_v10 = vmul.f32 0.5, %v758_v9 }
 0x7e1   :  { %v760_v11 = vsub.f32 1.5, %v759_v10 }
 0x7e2   :  { %v2146_v12 = vpop.eup %2145 }
 0x7e3   :  { %v761_v13 = vmul.f32 %v2144_v6, %v760_v11  ;;  %v767_v14 = vmul.f32 %v2146_v12, %v755_v7  ;;  %vm773_vm12 = vweird.f32 %v2146_v12 }
 0x7e4   :  { %vm774_vm14 = vmor %vm772_vm13, %vm773_vm12 }
 0x7e5   :  { %v768_v15 = vmul.f32 %v2146_v12, %v767_v14  ;;  %v765_v16 = vsel %vm764_vm11, %v2144_v6, %v761_v13 }
 0x7e6   :  { %v776_v20 = vmul.f32 %v765_v16, %v742_v55  ;;  %v2032_v16 = vld [vmem:[%s2827_s5 + $0x18] sm:$0xff] }
 0x7e7   :  { %v769_v17 = vmul.f32 0.5, %v768_v15  ;;  %989 = vmatpush.bf16.msrb.mxu3 %v2032_v16 }
 0x7e8   :  { %v781_v26 = vmul.f32 %v2095_v19, %v776_v20  ;;  %v2031_v20 = vld [vmem:[%s2827_s5 + $0x10] sm:$0xff] }
 0x7e9   :  { %v770_v18 = vsub.f32 1.5, %v769_v17 }
 0x7ea   :  { %v786_v31 = vadd.f32 %v2096_v25, %v781_v26 }
 0x7eb   :  { %v771_v24 = vmul.f32 %v2146_v12, %v770_v18  ;;  %990 = vmatpush.bf16.msrb.mxu3 %v2031_v20 }
 0x7ed   :  { %v775_v23 = vsel %vm774_vm14, %v2146_v12, %v771_v24 }
 0x7ee   :  { %v777_v28 = vmul.f32 %v775_v23, %v743_v59 }
 0x7f0   :  { %v782_v30 = vmul.f32 %v2095_v19, %v777_v28 }
 0x7f2   :  { %v787_v32 = vadd.f32 %v2096_v25, %v782_v30 }
 0x7f4   :  { %v788_v33 = vpack.c.bf16 %v787_v32, %v786_v31 }
 0x7f6   :  { %1907 = vmatmul.msk.bf16.vlgmr.msrb.gmra.mxu1 %vm181_vm3, %v788_v33 }
 0x873   :  { %v821_v39 = vpop.f32.mrf.mxu1 }
 0x874   :  { %v822_v42 = vadd.f32 %v2097_v38, %v821_v39 }
 0x876   :  { %v826_v43 = vmul.f32 %v822_v42, %v822_v42 }
 0x878   :  { %v828_v27 = vmul.f32 %v826_v43, %v822_v42 }
 0x87a   :  { %v830_v34 = vmul.f32 0.044715, %v828_v27 }
 0x87b   :  { %v823_v44 = vpop.f32.mrf.mxu1 }
 0x87c   :  { %v832_v29 = vadd.f32 %v830_v34, %v822_v42  ;;  %v824_v45 = vadd.f32 %v2097_v38, %v823_v44  ;;  %v2100_v44 = vld [vmem:[%s2838_s16] ss:$0 sm:$0xff] }
 0x87e   :  { %v834_v40 = vmul.f32 0.7978846, %v832_v29  ;;  %v827_v46 = vmul.f32 %v824_v45, %v824_v45 }
 0x880   :  { %v829_v47 = vmul.f32 %v827_v46, %v824_v45  ;;  %2147 = vtanh.f32 %v834_v40 }
 0x882   :  { %v831_v49 = vmul.f32 0.044715, %v829_v47 }
 0x884   :  { %v833_v50 = vadd.f32 %v831_v49, %v824_v45 }
 0x886   :  { %v835_v51 = vmul.f32 0.7978846, %v833_v50  ;;  %v2148_v52 = vpop.eup %2147  ;;  %v2101_v50 = vld [vmem:[%s2828_s6 + $0x1] ss:$0 sm:$0xff]  ;;  %s2859_s6 = smov 104  }
 0x887   :  { %v838_v21 = vadd.f32 1.0, %v2148_v52 }
 0x888   :  { %2149 = vtanh.f32 %v835_v51 }
 0x889   :  { %v840_v55 = vmul.f32 0.5, %v838_v21 }
 0x88b   :  { %v842_v57 = vmul.f32 %v840_v55, %v822_v42  ;;  %v2099_v42 = vld [vmem:[%s2837_s15] ss:$0 sm:$0xff] }
 0x88e   :  { %v2150_v54 = vpop.eup %2149 }
 0x88f   :  { %v839_v56 = vadd.f32 1.0, %v2150_v54 }
 0x891   :  { %v841_v22 = vmul.f32 0.5, %v839_v56 }
 0x893   :  { %v843_v58 = vmul.f32 %v841_v22, %v824_v45 }
 0x895   :  { %v844_v59 = vpack.c.bf16 %v843_v58, %v842_v57 }
 0x897   :  { %1924 = vmatmul.msk.bf16.vlgmr.msrb.gmra.mxu2 %vm881_vm15, %v844_v59 }
 0x91a   :  { %v894_v61 = vpop.f32.mrf.mxu2 }
 0x91b   :  { %v895_v63 = vadd.f32 %v2098_v60, %v894_v61 }
 0x91d   :  { %v899_v0 = vadd.f32 %v895_v63, %v786_v31 }
 0x91f   :  { %v903_v1 = vsel %vm181_vm3, %v899_v0, 0.0 }
 0x920   :  { %904 = vadd.xlane.f32.xlu2 %v903_v1 }
 0x922   :  { %v896_v2 = vpop.f32.mrf.mxu2 }
 0x923   :  { %v897_v3 = vadd.f32 %v2098_v60, %v896_v2 }
 0x925   :  { %v900_v4 = vadd.f32 %v897_v3, %v787_v32 }
 0x927   :  { %v906_v5 = vsel %vm181_vm3, %v900_v4, 0.0 }
 0x928   :  { %907 = vadd.xlane.f32.xlu0 %v906_v5 }
 0x993   :  { %v905_v6 = vpop.xlane.xlu2 %904 }
 0x994   :  { %v909_v7 = vmul.f32 %v905_v6, %v2537_v53 }
 0x996   :  { %v911_v8 = vsub.f32 %v899_v0, %v909_v7 }
 0x998   :  { %v913_v9 = vmul.f32 %v911_v8, %v911_v8 }
 0x99a   :  { %v915_v10 = vsel %vm181_vm3, %v913_v9, 0.0 }
 0x99b   :  { %v908_v11 = vpop.xlane.xlu0 %907  ;;  %916 = vadd.xlane.f32.xlu2 %v915_v10 }
 0x99c   :  { %v910_v12 = vmul.f32 %v908_v11, %v2537_v53 }
 0x99e   :  { %v912_v13 = vsub.f32 %v900_v4, %v910_v12 }
 0x9a0   :  { %v914_v14 = vmul.f32 %v912_v13, %v912_v13 }
 0x9a2   :  { %v918_v15 = vsel %vm181_vm3, %v914_v14, 0.0 }
 0x9a3   :  { %919 = vadd.xlane.f32.xlu0 %v918_v15 }
 0xa0e   :  { %v917_v17 = vpop.xlane.xlu2 %916 }
 0xa0f   :  { %v921_v18 = vmul.f32 %v917_v17, %v2537_v53 }
 0xa11   :  { %v923_v19 = vadd.f32 1e-12, %v921_v18 }
 0xa13   :  { %2151 = vrsqrt.f32 %v923_v19  ;;  %vm931_vm1 = vweird.f32 %v923_v19 }
 0xa16   :  { %v920_v24 = vpop.xlane.xlu0 %919 }
 0xa17   :  { %v922_v23 = vmul.f32 %v920_v24, %v2537_v53 }
 0xa19   :  { %v2152_v25 = vpop.eup %2151  ;;  %v924_v26 = vadd.f32 1e-12, %v922_v23 }
 0xa1a   :  { %v926_v28 = vmul.f32 %v2152_v25, %v923_v19  ;;  %vm932_vm0 = vweird.f32 %v2152_v25 }
 0xa1b   :  { %2153 = vrsqrt.f32 %v924_v26  ;;  %vm933_vm2 = vmor %vm931_vm1, %vm932_vm0  ;;  %vm941_vm9 = vweird.f32 %v924_v26 }
 0xa1c   :  { %v927_v30 = vmul.f32 %v2152_v25, %v926_v28 }
 0xa1e   :  { %v928_v31 = vmul.f32 0.5, %v927_v30 }
 0xa20   :  { %v929_v32 = vsub.f32 1.5, %v928_v31 }
 0xa21   :  { %v2154_v33 = vpop.eup %2153 }
 0xa22   :  { %v930_v35 = vmul.f32 %v2152_v25, %v929_v32  ;;  %v936_v36 = vmul.f32 %v2154_v33, %v924_v26  ;;  %vm942_vm8 = vweird.f32 %v2154_v33 }
 0xa23   :  { %vm943_vm10 = vmor %vm941_vm9, %vm942_vm8  ;;  %vm1785_vm8 = vcmask 1041409   ;;  %vm1788_vm9 = vcmask 254976  }
 0xa24   :  { %v937_v37 = vmul.f32 %v2154_v33, %v936_v36  ;;  %v934_v38 = vsel %vm933_vm2, %v2152_v25, %v930_v35 }
 0xa25   :  { %v945_v43 = vmul.f32 %v934_v38, %v911_v8 }
 0xa26   :  { %v938_v39 = vmul.f32 0.5, %v937_v37 }
 0xa27   :  { %v950_v29 = vmul.f32 %v2099_v42, %v945_v43 }
 0xa28   :  { %v939_v41 = vsub.f32 1.5, %v938_v39 }
 0xa29   :  { %v2597_v46 = vadd.f32 %v2100_v44, %v950_v29 }
 0xa2a   :  { %v940_v27 = vmul.f32 %v2154_v33, %v939_v41 }
 0xa2c   :  { %v944_v34 = vsel %vm943_vm10, %v2154_v33, %v940_v27 }
 0xa2d   :  { %v946_v45 = vmul.f32 %v944_v34, %v912_v13 }
 0xa2f   :  { %v951_v40 = vmul.f32 %v2099_v42, %v946_v45  ;;  %v2201_v45 = vld [vmem:[%s2858_s0] ss:$0 sm:$0xff]  ;;  %s2863_s0 = smov 40  }
 0xa31   :  { %v2599_v47 = vadd.f32 %v2100_v44, %v951_v40 }
 0xa33   :  { %v957_v49 = vpack.c.bf16 %v2599_v47, %v2597_v46 }
 0xa35   :  { %1938 = vmatmul.msk.bf16.vlgmr.msrb.gmra.mxu3 %vm181_vm3, %v957_v49 }
 0xab8   :  { %v992_v51 = vpop.f32.mrf.mxu3 }
 0xab9   :  { %v993_v52 = vadd.f32 %v2101_v50, %v992_v51 }
 0xabb   :  { %v997_v21 = vpack.c.bf16 %v993_v52, %v993_v52 }
 0xabd   :  { %v1000_v54 = vunpack.c.l.b16 %v997_v21 }
 0xabf   :  { %v2607_v55 = vpack.c.b16 %v1000_v54, %v1000_v54 }
 0xac0   :  { %v994_v56 = vpop.f32.mrf.mxu3 }
 0xac1   :  { %v995_v22 = vadd.f32 %v2101_v50, %v994_v56  ;;  %1115 = vrot.lane.b32.xlu0 %v2607_v55, %s2232_s23  ;;  %1002 = vrot.lane.b32.xlu1 %v2607_v55, %s2231_s22 }
 0xac3   :  { %v998_v57 = vpack.c.bf16 %v995_v22, %v995_v22 }
 0xac5   :  { %v1024_v58 = vunpack.c.l.b16 %v998_v57 }
 0xac7   :  { %v2613_v59 = vpack.c.b16 %v1024_v58, %v1024_v58 }
 0xac9   :  { %1026 = vrot.lane.b32.xlu2 %v2613_v59, %s2231_s22  ;;  %1138 = vrot.lane.b32.xlu0 %v2613_v59, %s2232_s23  ;;  %s2860_s22 = smov 64  }
 0xaca   :  { %1113 = vrot.lane.b32.xlu1 %v2607_v55, %s2233_s24 }
 0xad1   :  { %1136 = vrot.lane.b32.xlu2 %v2613_v59, %s2233_s24  ;;  %1227 = vrot.lane.b32.xlu0 %v2607_v55, %s2237_s30 }
 0xad2   :  { %1250 = vrot.lane.b32.xlu1 %v2613_v59, %s2237_s30  ;;  %s2864_s30 = smov 8  }
 0xad9   :  { %1225 = vrot.lane.b32.xlu2 %v2607_v55, %s2234_s25  ;;  %1248 = vrot.lane.b32.xlu0 %v2613_v59, %s2234_s25  ;;  %s2861_s25 = smov 56  }
 0xada   :  { %1339 = vrot.lane.b32.xlu1 %v2607_v55, %s2235_s26 }
 0xae1   :  { %1362 = vrot.lane.b32.xlu2 %v2613_v59, %s2235_s26  ;;  %1337 = vrot.lane.b32.xlu0 %v2607_v55, %s2859_s6  ;;  %s2862_s26 = smov 48  }
 0xae2   :  { %1360 = vrot.lane.b32.xlu1 %v2613_v59, %s2859_s6 }
 0xae9   :  { %1071 = vrot.lane.b32.xlu0 %v2607_v55, %s2860_s22 }
 0xb23   :  { %v1027_v60 = vpop.permute.xlu2 %1026 }
 0xb24   :  { %v1032_v61 = vsel %vm206_vm4, %v1027_v60, 0 }
 0xb25   :  { %1041 = vmatpush.bf16.xpose.msra.mxu1 %v1032_v61 }
 0xb2b   :  { %v1137_v63 = vpop.permute.xlu2 %1136 }
 0xb2c   :  { %1940 = vmatmul.msk.bf16.vlgmr.msra.gmra.mxu1 %vm206_vm4, %v998_v57 }
 0xb33   :  { %v1116_v0 = vpop.permute.xlu0 %1115  ;;  %v1003_v2 = vpop.permute.xlu1 %1002 }
 0xb34   :  { %v1121_v1 = vsel %vm206_vm4, %v1116_v0, 0  ;;  %v1008_v3 = vsel %vm206_vm4, %v1003_v2, 0  ;;  %v1226_v4 = vpop.permute.xlu2 %1225 }
 0xb35   :  { %1017 = vmatpush.bf16.xpose.msra.mxu0 %v1008_v3 }
 0xb3b   :  { %v1139_v5 = vpop.permute.xlu0 %1138 }
 0xb3c   :  { %v1144_v6 = vsel %vm206_vm4, %v1139_v5, 0  ;;  %v1114_v7 = vpop.permute.xlu1 %1113  ;;  %1939 = vmatmul.msk.bf16.vlgmr.msra.gmra.mxu0 %vm206_vm4, %v997_v21  ;;  %v1363_v8 = vpop.permute.xlu2 %1362 }
 0xb3d   :  { %1130 = vmatpush.bf16.xpose.msrb.mxu0 %v1121_v1  ;;  %1153 = vmatpush.bf16.xpose.msrb.mxu1 %v1144_v6  ;;  %v1368_v13 = vsel %vm206_vm4, %v1363_v8, 0 }
 0xb43   :  { %v1228_v9 = vpop.permute.xlu0 %1227 }
 0xb44   :  { %v1233_v10 = vsel %vm206_vm4, %v1228_v9, 0  ;;  %v1251_v11 = vpop.permute.xlu1 %1250  ;;  %1944 = vmatmul.msk.bf16.vlgmr.msrb.gmra.mxu1 %vm206_vm4, %v1137_v63 }
 0xb45   :  { %v1256_v12 = vsel %vm206_vm4, %v1251_v11, 0  ;;  %1242 = vmatpush.bf16.xpose.msra.mxu0 %v1233_v10 }
 0xb46   :  { %1265 = vmatpush.bf16.xpose.msra.mxu1 %v1256_v12 }
 0xb4b   :  { %v1249_v14 = vpop.permute.xlu0 %1248 }
 0xb4c   :  { %v1340_v15 = vpop.permute.xlu1 %1339  ;;  %1943 = vmatmul.msk.bf16.vlgmr.msrb.gmra.mxu0 %vm206_vm4, %v1114_v7 }
 0xb4d   :  { %v1345_v16 = vsel %vm206_vm4, %v1340_v15, 0 }
 0xb4e   :  { %1377 = vmatpush.bf16.xpose.msrb.mxu1 %v1368_v13  ;;  %1354 = vmatpush.bf16.xpose.msrb.mxu0 %v1345_v16 }
 0xb53   :  { %v1338_v17 = vpop.permute.xlu0 %1337 }
 0xb54   :  { %1948 = vmatmul.msk.bf16.vlgmr.msra.gmra.mxu1 %vm206_vm4, %v1249_v14  ;;  %v1361_v20 = vpop.permute.xlu1 %1360 }
 0xb5b   :  { %v1072_v18 = vpop.permute.xlu0 %1071 }
 0xb5c   :  { %v1077_v19 = vsel %vm279_vm5, %v1072_v18, 0  ;;  %1947 = vmatmul.msk.bf16.vlgmr.msra.gmra.mxu0 %vm206_vm4, %v1226_v4 }
 0xb5d   :  { %1086 = vmatpush.bf16.msra.mxu2 %v1077_v19 }
 0xb64   :  { %1952 = vmatmul.msk.bf16.vlgmr.msrb.gmra.mxu1 %vm206_vm4, %v1361_v20 }
 0xb6c   :  { %1951 = vmatmul.msk.bf16.vlgmr.msrb.gmra.mxu0 %vm206_vm4, %v1338_v17 }
 0xba9   :  { %v1043_v24 = vpop.f32.mrf.mxu1 }
 0xbaa   :  { %v1044_v23 = vadd.f32 %v2440_v62, %v1043_v24 }
 0xbac   :  { %v1050_v25 = vsel %vm206_vm4, %v1044_v23, -inf }
 0xbad   :  { %1051 = vmax.xlane.f32.xlu0 %v1050_v25 }
 0xbb1   :  { %v1045_v26 = vpop.f32.mrf.mxu1 }
 0xbb9   :  { %v1019_v28 = vpop.f32.mrf.mxu0 }
 0xbba   :  { %v1020_v30 = vadd.f32 %v2422_v48, %v1019_v28 }
 0xbbc   :  { %v1047_v31 = vsel %vm206_vm4, %v1020_v30, -inf }
 0xbbd   :  { %1048 = vmax.xlane.f32.xlu2 %v1047_v31 }
 0xbc1   :  { %v1155_v32 = vpop.f32.mrf.mxu1  ;;  %v1021_v33 = vpop.f32.mrf.mxu0 }
 0xbc2   :  { %v2663_v35 = vadd.f32 %v2440_v62, %v1155_v32 }
 0xbc4   :  { %v1162_v36 = vsel %vm206_vm4, %v2663_v35, -inf }
 0xbc5   :  { %1163 = vmax.xlane.f32.xlu2 %v1162_v36 }
 0xbc9   :  { %v1157_v37 = vpop.f32.mrf.mxu1  ;;  %v1132_v38 = vpop.f32.mrf.mxu0 }
 0xbca   :  { %v1133_v39 = vadd.f32 %v2422_v48, %v1132_v38 }
 0xbcc   :  { %v1159_v41 = vsel %vm206_vm4, %v1133_v39, -inf }
 0xbcd   :  { %1160 = vmax.xlane.f32.xlu1 %v1159_v41 }
 0xbd1   :  { %v1267_v42 = vpop.f32.mrf.mxu1  ;;  %v1134_v43 = vpop.f32.mrf.mxu0 }
 0xbd2   :  { %v1268_v27 = vadd.f32 %v2440_v62, %v1267_v42 }
 0xbd4   :  { %v1274_v34 = vsel %vm206_vm4, %v1268_v27, -inf }
 0xbd5   :  { %1275 = vmax.xlane.f32.xlu2 %v1274_v34 }
 0xbd9   :  { %v1269_v44 = vpop.f32.mrf.mxu1  ;;  %v1244_v29 = vpop.f32.mrf.mxu0 }
 0xbda   :  { %v1245_v40 = vadd.f32 %v2201_v45, %v1244_v29 }
 0xbdc   :  { %v1271_v49 = vsel %vm206_vm4, %v1245_v40, -inf }
 0xbdd   :  { %1272 = vmax.xlane.f32.xlu0 %v1271_v49 }
 0xbe1   :  { %v1379_v48 = vpop.f32.mrf.mxu1  ;;  %v1246_v50 = vpop.f32.mrf.mxu0 }
 0xbe2   :  { %v1380_v51 = vadd.f32 %v2440_v62, %v1379_v48 }
 0xbe4   :  { %v1386_v52 = vsel %vm206_vm4, %v1380_v51, -inf }
 0xbe5   :  { %1387 = vmax.xlane.f32.xlu0 %v1386_v52 }
 0xbe6   :  { %1183 = vrot.lane.b32.xlu1 %v2607_v55, %s2861_s25 }
 0xbe9   :  { %v1381_v21 = vpop.f32.mrf.mxu1  ;;  %v1356_v54 = vpop.f32.mrf.mxu0 }
 0xbea   :  { %v2683_v22 = vadd.f32 %v2201_v45, %v1356_v54 }
 0xbec   :  { %v1383_v62 = vsel %vm206_vm4, %v2683_v22, -inf }
 0xbed   :  { %1092 = vrot.lane.b32.xlu2 %v2613_v59, %s2860_s22 }
 0xbf1   :  { %v1358_v56 = vpop.f32.mrf.mxu0 }
 0xbf9   :  { %1204 = vrot.lane.b32.xlu0 %v2613_v59, %s2861_s25 }
 0xc10   :  { %1384 = vmax.xlane.f32.xlu1 %v1383_v62 }
 0xc20   :  { %v1052_v0 = vpop.xlane.xlu0 %1051 }
 0xc21   :  { %v1054_v2 = vsub.f32 %v1044_v23, %v1052_v0 }
 0xc23   :  { %v1057_v3 = vmul.f32 1.442695, %v1054_v2 }
 0xc29   :  { %1295 = vrot.lane.b32.xlu1 %v2607_v55, %s2862_s26 }
 0xc30   :  { %v1049_v57 = vpop.xlane.xlu2 %1048 }
 0xc31   :  { %v1053_v58 = vsub.f32 %v1020_v30, %v1049_v57 }
 0xc33   :  { %v1055_v60 = vmul.f32 1.442695, %v1053_v58 }
 0xc35   :  { %2155 = vpow2.f32 %v1055_v60 }
 0xc36   :  { %2157 = vpow2.f32 %v1057_v3 }
 0xc38   :  { %v1164_v1 = vpop.xlane.xlu2 %1163 }
 0xc39   :  { %v1166_v14 = vsub.f32 %v2663_v35, %v1164_v1 }
 0xc3b   :  { %v2689_v61 = vpop.eup %2155  ;;  %v1169_v20 = vmul.f32 1.442695, %v1166_v14 }
 0xc3c   :  { %v1059_v63 = vsel %vm206_vm4, %v2689_v61, 0.0  ;;  %v2158_v10 = vpop.eup %2157 }
 0xc3d   :  { %1060 = vadd.xlane.f32.xlu2 %v1059_v63  ;;  %v1062_v17 = vsel %vm206_vm4, %v2158_v10, 0.0 }
 0xc40   :  { %v1161_v4 = vpop.xlane.xlu1 %1160 }
 0xc41   :  { %v1165_v7 = vsub.f32 %v1133_v39, %v1161_v4 }
 0xc43   :  { %v1167_v9 = vmul.f32 1.442695, %v1165_v7 }
 0xc48   :  { %v1276_v5 = vpop.xlane.xlu2 %1275 }
 0xc49   :  { %v1278_v6 = vsub.f32 %v1268_v27, %v1276_v5 }
 0xc4b   :  { %v1281_v8 = vmul.f32 1.442695, %v1278_v6 }
 0xc4d   :  { %2159 = vpow2.f32 %v1281_v8 }
 0xc4e   :  { %2161 = vpow2.f32 %v1167_v9 }
 0xc50   :  { %v1093_v11 = vpop.permute.xlu2 %1092  ;;  %v1273_v12 = vpop.xlane.xlu0 %1272 }
 0xc51   :  { %v1098_v13 = vsel %vm279_vm5, %v1093_v11, 0  ;;  %v1277_v15 = vsub.f32 %v1245_v40, %v1273_v12 }
 0xc52   :  { %1107 = vmatpush.bf16.msra.mxu3 %v1098_v13 }
 0xc53   :  { %v2695_v16 = vpop.eup %2159  ;;  %v1279_v18 = vmul.f32 1.442695, %v1277_v15  ;;  %1063 = vadd.xlane.f32.xlu1 %v1062_v17 }
 0xc54   :  { %v1286_v19 = vsel %vm206_vm4, %v2695_v16, 0.0  ;;  %v2162_v24 = vpop.eup %2161 }
 0xc55   :  { %1287 = vadd.xlane.f32.xlu0 %v1286_v19  ;;  %2163 = vpow2.f32 %v1279_v18  ;;  %v1171_v30 = vsel %vm206_vm4, %v2162_v24, 0.0 }
 0xc56   :  { %2165 = vpow2.f32 %v1169_v20 }
 0xc58   :  { %v1388_v23 = vpop.xlane.xlu0 %1387  ;;  %v1184_v25 = vpop.permute.xlu1 %1183 }
 0xc59   :  { %v1390_v26 = vsub.f32 %v1380_v51, %v1388_v23  ;;  %v1189_v28 = vsel %vm279_vm5, %v1184_v25, 0 }
 0xc5a   :  { %1198 = vmatpush.bf16.msrb.mxu2 %v1189_v28 }
 0xc5b   :  { %v2164_v31 = vpop.eup %2163  ;;  %v1393_v32 = vmul.f32 1.442695, %v1390_v26  ;;  %1172 = vadd.xlane.f32.xlu1 %v1171_v30 }
 0xc5c   :  { %v1283_v33 = vsel %vm206_vm4, %v2164_v31, 0.0  ;;  %v2166_v35 = vpop.eup %2165 }
 0xc5d   :  { %2167 = vpow2.f32 %v1393_v32  ;;  %1284 = vadd.xlane.f32.xlu2 %v1283_v33  ;;  %v1174_v36 = vsel %vm206_vm4, %v2166_v35, 0.0 }
 0xc63   :  { %v2704_v37 = vpop.eup %2167  ;;  %1175 = vadd.xlane.f32.xlu1 %v1174_v36 }
 0xc64   :  { %v1398_v38 = vsel %vm206_vm4, %v2704_v37, 0.0 }
 0xc65   :  { %1399 = vadd.xlane.f32.xlu2 %v1398_v38 }
 0xc69   :  { %1407 = vrot.lane.b32.xlu0 %v2607_v55, %s2863_s0 }
 0xc6b   :  { %v1205_v39 = vpop.permute.xlu0 %1204 }
 0xc6c   :  { %v1210_v41 = vsel %vm279_vm5, %v1205_v39, 0 }
 0xc6d   :  { %1219 = vmatpush.bf16.msrb.mxu3 %v1210_v41 }
 0xc7c   :  { %1316 = vrot.lane.b32.xlu1 %v2613_v59, %s2862_s26 }
 0xc7d   :  { %1428 = vrot.lane.b32.xlu2 %v2613_v59, %s2863_s0 }
 0xc83   :  { %v1385_v42 = vpop.xlane.xlu1 %1384 }
 0xc84   :  { %v1389_v43 = vsub.f32 %v2683_v22, %v1385_v42 }
 0xc86   :  { %v1391_v27 = vmul.f32 1.442695, %v1389_v43 }
 0xc88   :  { %2169 = vpow2.f32 %v1391_v27 }
 0xc8e   :  { %v2170_v34 = vpop.eup %2169 }
 0xc8f   :  { %v1395_v44 = vsel %vm206_vm4, %v2170_v34, 0.0 }
 0xc9b   :  { %v1296_v40 = vpop.permute.xlu1 %1295 }
 0xc9c   :  { %v1301_v48 = vsel %vm279_vm5, %v1296_v40, 0 }
 0xca6   :  { %1396 = vadd.xlane.f32.xlu1 %v1395_v44  ;;  %v2033_v44 = vld [vmem:[%s2829_s7 + $0x10] sm:$0xff] }
 0xcb0   :  { %v1061_v55 = vpop.xlane.xlu2 %1060 }
 0xcb1   :  { %2171 = vrcp.f32 %v1061_v55 }
 0xcb7   :  { %v2172_v29 = vpop.eup %2171 }
 0xcb8   :  { %v1067_v45 = vmul.f32 %v2172_v29, %v2689_v61 }
 0xcba   :  { %v1069_v49 = vpack.c.bf16 %v1067_v45, %v1067_v45 }
 0xcbc   :  { %1941 = vmatmul.msk.bf16.vlgmr.msra.gmra.mxu2 %vm206_vm4, %v1069_v49 }
 0xcbd   :  { %1310 = vmatpush.bf16.msra.mxu2 %v1301_v48 }
 0xcc6   :  { %v1064_v59 = vpop.xlane.xlu1 %1063 }
 0xcc7   :  { %2173 = vrcp.f32 %v1064_v59 }
 0xcc8   :  { %v1288_v54 = vpop.xlane.xlu0 %1287 }
 0xccd   :  { %v2174_v50 = vpop.eup %2173 }
 0xcce   :  { %v1068_v51 = vmul.f32 %v2174_v50, %v2158_v10  ;;  %v1173_v52 = vpop.xlane.xlu1 %1172 }
 0xccf   :  { %2175 = vrcp.f32 %v1173_v52 }
 0xcd0   :  { %v1070_v21 = vpack.c.bf16 %v1068_v51, %v1068_v51  ;;  %v1285_v58 = vpop.xlane.xlu2 %1284 }
 0xcd2   :  { %1942 = vmatmul.msk.bf16.vlgmr.msra.gmra.mxu3 %vm206_vm4, %v1070_v21 }
 0xcd5   :  { %v2176_v56 = vpop.eup %2175 }
 0xcd6   :  { %v1179_v22 = vmul.f32 %v2176_v56, %v2162_v24  ;;  %v1176_v62 = vpop.xlane.xlu1 %1175 }
 0xcd7   :  { %2177 = vrcp.f32 %v1176_v62 }
 0xcd8   :  { %v1181_v57 = vpack.c.bf16 %v1179_v22, %v1179_v22  ;;  %2179 = vrcp.f32 %v1285_v58  ;;  %v1400_v3 = vpop.xlane.xlu2 %1399  ;;  %v2102_v58 = vld [vmem:[%s2830_s8 + $0x1] ss:$0 sm:$0xff]  ;;  %s1822_s8 = sshll.u32 %s2839_s17, 4  ;;  %s1823_s8 = int_to_ptr.hbm [resolvable:$true] %s1822_s8 }
 0xcd9   :  { %2181 = vrcp.f32 %v1288_v54 }
 0xcda   :  { %1945 = vmatmul.msk.bf16.vlgmr.msrb.gmra.mxu2 %vm206_vm4, %v1181_v57  ;;  %2183 = vrcp.f32 %v1400_v3 }
 0xcdb   :  { %v1408_v60 = vpop.permute.xlu0 %1407 }
 0xcdc   :  { %v1413_v61 = vsel %vm279_vm5, %v1408_v60, 0 }
 0xcdd   :  { %1422 = vmatpush.bf16.msrb.mxu2 %v1413_v61  ;;  %v2178_v63 = vpop.eup %2177 }
 0xcde   :  { %v1180_v0 = vmul.f32 %v2178_v63, %v2166_v35  ;;  %v2180_v2 = vpop.eup %2179 }
 0xcdf   :  { %v1291_v4 = vmul.f32 %v2180_v2, %v2164_v31  ;;  %v2182_v6 = vpop.eup %2181 }
 0xce0   :  { %v1182_v1 = vpack.c.bf16 %v1180_v0, %v1180_v0  ;;  %v1292_v7 = vmul.f32 %v2182_v6, %v2695_v16  ;;  %v1429_v8 = vpop.permute.xlu2 %1428  ;;  %v2184_v13 = vpop.eup %2183 }
 0xce1   :  { %v1293_v5 = vpack.c.bf16 %v1291_v4, %v1291_v4  ;;  %v1434_v11 = vsel %vm279_vm5, %v1429_v8, 0  ;;  %v1404_v14 = vmul.f32 %v2184_v13, %v2704_v37 }
 0xce2   :  { %1946 = vmatmul.msk.bf16.vlgmr.msrb.gmra.mxu3 %vm206_vm4, %v1182_v1  ;;  %v1294_v12 = vpack.c.bf16 %v1292_v7, %v1292_v7 }
 0xce3   :  { %v1406_v15 = vpack.c.bf16 %v1404_v14, %v1404_v14  ;;  %v2036_v14 = vld [vmem:[%s2833_s11 + $0x18] sm:$0xff] }
 0xce4   :  { %1611 = vmatpush.bf16.msra.mxu1 %v2036_v14 }
 0xcea   :  { %1949 = vmatmul.msk.bf16.vlgmr.msra.gmra.mxu2 %vm206_vm4, %v1293_v5  ;;  %v1754_v5 = vld [vmem:[%s2824_s2 + $0x8] sm:$0xff] }
 0xcee   :  { %v1317_v9 = vpop.permute.xlu1 %1316 }
 0xcef   :  { %v1322_v10 = vsel %vm279_vm5, %v1317_v9, 0 }
 0xcf0   :  { %1331 = vmatpush.bf16.msra.mxu3 %v1322_v10 }
 0xcf3   :  { %1950 = vmatmul.msk.bf16.vlgmr.msra.gmra.mxu3 %vm206_vm4, %v1294_v12 }
 0xcf4   :  { %1443 = vmatpush.bf16.msrb.mxu3 %v1434_v11 }
 0xd03   :  { %1954 = vmatmul.msk.bf16.vlgmr.msrb.gmra.mxu3 %vm206_vm4, %v1406_v15 }
 0xd19   :  { %v1397_v17 = vpop.xlane.xlu1 %1396 }
 0xd1a   :  { %2185 = vrcp.f32 %v1397_v17 }
 0xd20   :  { %v2186_v16 = vpop.eup %2185 }
 0xd21   :  { %v1403_v18 = vmul.f32 %v2186_v16, %v2170_v34  ;;  %v2034_v34 = vld [vmem:[%s2829_s7 + $0x18] sm:$0xff] }
 0xd22   :  { %1511 = vmatpush.bf16.msra.mxu0 %v2034_v34 }
 0xd23   :  { %v1405_v19 = vpack.c.bf16 %v1403_v18, %v1403_v18  ;;  %v2035_v18 = vld [vmem:[%s2833_s11 + $0x10] sm:$0xff] }
 0xd24   :  { %1612 = vmatpush.bf16.msra.mxu1 %v2035_v18 }
 0xd25   :  { %1953 = vmatmul.msk.bf16.vlgmr.msrb.gmra.mxu2 %vm206_vm4, %v1405_v19 }
 0xd26   :  { %1512 = vmatpush.bf16.msra.mxu0 %v2033_v44 }
 0xd3f   :  { %v1088_v20 = vpop.f32.mrf.mxu2 }
 0xd47   :  { %v1090_v24 = vpop.f32.mrf.mxu2 }
 0xd55   :  { %v1109_v23 = vpop.f32.mrf.mxu3 }
 0xd5d   :  { %v1111_v25 = vpop.f32.mrf.mxu3  ;;  %v1200_v26 = vpop.f32.mrf.mxu2 }
 0xd65   :  { %v1202_v28 = vpop.f32.mrf.mxu2  ;;  %v1221_v30 = vpop.f32.mrf.mxu3 }
 0xd66   :  { %v2075_v31 = vpack.i.bf16 %v1221_v30, %v1200_v26 }
 0xd68   :  { %2076 = vrot.lane.b32.xlu0 %v2075_v31, %s2864_s30 }
 0xd6d   :  { %v1223_v32 = vpop.f32.mrf.mxu3  ;;  %v1312_v33 = vpop.f32.mrf.mxu2 }
 0xd75   :  { %v1314_v35 = vpop.f32.mrf.mxu2 }
 0xd76   :  { %v1333_v36 = vpop.f32.mrf.mxu3 }
 0xd77   :  { %v2080_v37 = vpack.i.bf16 %v1333_v36, %v1312_v33 }
 0xd79   :  { %2081 = vrot.lane.b32.xlu0 %v2080_v37, %s2865_s27 }
 0xd7e   :  { %v1335_v38 = vpop.f32.mrf.mxu3 }
 0xd86   :  { %v1445_v39 = vpop.f32.mrf.mxu3 }
 0xd8e   :  { %v1447_v41 = vpop.f32.mrf.mxu3 }
 0xda8   :  { %v1424_v42 = vpop.f32.mrf.mxu2 }
 0xda9   :  { %v2085_v43 = vpack.i.bf16 %v1445_v39, %v1424_v42  ;;  %v2103_v39 = vld [vmem:[%s2831_s9 + $0x1] ss:$0 sm:$0xff] }
 0xdab   :  { %2086 = vrot.lane.b32.xlu2 %v2085_v43, %s2866_s3 }
 0xdb0   :  { %v1426_v27 = vpop.f32.mrf.mxu2 }
 0xdb1   :  { %v2104_v27 = vld [vmem:[%s2832_s10 + $0x1] ss:$0 sm:$0xff] }
 0xdda   :  { %v2077_v55 = vpop.permute.xlu0 %2076 }
 0xddb   :  { %v2079_v45 = vunpack.i.h.bf16 %v2077_v55  ;;  %v2078_v40 = vunpack.i.l.bf16 %v2077_v55 }
 0xddd   :  { %v1474_v50 = vsel %vm206_vm4, %v1109_v23, %v2079_v45  ;;  %v1473_v51 = vsel %vm206_vm4, %v1088_v20, %v2078_v40 }
 0xdeb   :  { %v2082_v29 = vpop.permute.xlu0 %2081 }
 0xdec   :  { %v2084_v49 = vunpack.i.h.bf16 %v2082_v29  ;;  %v2083_v48 = vunpack.i.l.bf16 %v2082_v29 }
 0xdee   :  { %v1476_v54 = vsel %vm679_vm6, %v1474_v50, %v2084_v49  ;;  %v1475_v56 = vsel %vm679_vm6, %v1473_v51, %v2083_v48  ;;  %v2040_v49 = vld [vmem:[%s2835_s13 + $0x38] sm:$0xff]  ;;  %v2039_v48 = vld [vmem:[%s2835_s13 + $0x30] sm:$0xff]  ;;  %v2105_v50 = vld [vmem:[%s2834_s12 + $0x1] ss:$0 sm:$0xff] }
 0xdef   :  { %1683 = vmatpush.bf16.msra.mxu2 %v2040_v49 }
 0xdf3   :  { %1684 = vmatpush.bf16.msra.mxu2 %v2039_v48 }
 0xe05   :  { %v2087_v59 = vpop.permute.xlu2 %2086 }
 0xe06   :  { %v2089_v52 = vunpack.i.h.bf16 %v2087_v59  ;;  %v2088_v21 = vunpack.i.l.bf16 %v2087_v59  ;;  %v2038_v59 = vld [vmem:[%s2835_s13 + $0x28] sm:$0xff] }
 0xe07   :  { %1685 = vmatpush.bf16.msra.mxu2 %v2038_v59 }
 0xe08   :  { %v1478_v22 = vsel %vm682_vm7, %v1476_v54, %v2089_v52  ;;  %v1477_v62 = vsel %vm682_vm7, %v1475_v56, %v2088_v21  ;;  %v2037_v52 = vld [vmem:[%s2835_s13 + $0x20] sm:$0xff] }
 0xe09   :  { %v1479_v57 = vpack.c.bf16 %v1478_v22, %v1477_v62 }
 0xe0b   :  { %1968 = vmatmul.msk.bf16.vlgmr.msra.gmra.mxu0 %vm181_vm3, %v1479_v57  ;;  %1686 = vmatpush.bf16.msra.mxu2 %v2037_v52 }
 0xe88   :  { %v1514_v60 = vpop.f32.mrf.mxu0 }
 0xe89   :  { %v1515_v61 = vadd.f32 %v2102_v58, %v1514_v60 }
 0xe8b   :  { %v1519_v63 = vadd.f32 %v1515_v61, %v2597_v46 }
 0xe8d   :  { %v1525_v0 = vsel %vm181_vm3, %v1519_v63, 0.0 }
 0xe8e   :  { %1526 = vadd.xlane.f32.xlu1 %v1525_v0 }
 0xe90   :  { %v1516_v1 = vpop.f32.mrf.mxu0 }
 0xe91   :  { %v1517_v2 = vadd.f32 %v2102_v58, %v1516_v1 }
 0xe93   :  { %v1520_v3 = vadd.f32 %v1517_v2, %v2599_v47 }
 0xe95   :  { %v1528_v4 = vsel %vm181_vm3, %v1520_v3, 0.0 }
 0xe96   :  { %1529 = vadd.xlane.f32.xlu0 %v1528_v4 }
 0xeaa   :  { %1762 = vperm.xlu0 %2059, %v1754_v5  }
 0xf01   :  { %v1527_v6 = vpop.xlane.xlu1 %1526 }
 0xf02   :  { %v1531_v7 = vmul.f32 %v1527_v6, %v2537_v53 }
 0xf04   :  { %v1533_v8 = vsub.f32 %v1519_v63, %v1531_v7 }
 0xf06   :  { %v1535_v46 = vmul.f32 %v1533_v8, %v1533_v8 }
 0xf08   :  { %v1537_v9 = vsel %vm181_vm3, %v1535_v46, 0.0 }
 0xf09   :  { %v1530_v10 = vpop.xlane.xlu0 %1529  ;;  %1538 = vadd.xlane.f32.xlu2 %v1537_v9 }
 0xf0a   :  { %v1532_v11 = vmul.f32 %v1530_v10, %v2537_v53 }
 0xf0c   :  { %v1534_v47 = vsub.f32 %v1520_v3, %v1532_v11  ;;  %v2106_v11 = vld [vmem:[%s2836_s14 + $0x1] ss:$0 sm:$0xff] }
 0xf0e   :  { %v1536_v12 = vmul.f32 %v1534_v47, %v1534_v47 }
 0xf10   :  { %v1540_v13 = vsel %vm181_vm3, %v1536_v12, 0.0 }
 0xf11   :  { %1541 = vadd.xlane.f32.xlu1 %v1540_v13 }
 0xf7c   :  { %v1539_v15 = vpop.xlane.xlu2 %1538 }
 0xf7d   :  { %v1543_v17 = vmul.f32 %v1539_v15, %v2537_v53 }
 0xf7f   :  { %v1545_v16 = vadd.f32 1e-12, %v1543_v17 }
 0xf81   :  { %2187 = vrsqrt.f32 %v1545_v16  ;;  %vm1553_vm5 = vweird.f32 %v1545_v16 }
 0xf84   :  { %v1542_v19 = vpop.xlane.xlu1 %1541 }
 0xf85   :  { %v1544_v20 = vmul.f32 %v1542_v19, %v2537_v53  ;;  %v1753_v19 = vld [vmem:[%s2824_s2] sm:$0xff] }
 0xf86   :  { %1757 = vperm.xlu2 %2090, %v1753_v19  }
 0xf87   :  { %v2188_v24 = vpop.eup %2187  ;;  %v1546_v23 = vadd.f32 1e-12, %v1544_v20 }
 0xf88   :  { %v1548_v25 = vmul.f32 %v2188_v24, %v1545_v16  ;;  %vm1554_vm4 = vweird.f32 %v2188_v24 }
 0xf89   :  { %2189 = vrsqrt.f32 %v1546_v23  ;;  %vm1555_vm6 = vmor %vm1553_vm5, %vm1554_vm4  ;;  %vm1563_vm11 = vweird.f32 %v1546_v23 }
 0xf8a   :  { %v1549_v26 = vmul.f32 %v2188_v24, %v1548_v25 }
 0xf8c   :  { %v1550_v28 = vmul.f32 0.5, %v1549_v26 }
 0xf8e   :  { %v1551_v30 = vsub.f32 1.5, %v1550_v28 }
 0xf8f   :  { %v2190_v31 = vpop.eup %2189 }
 0xf90   :  { %v1552_v32 = vmul.f32 %v2188_v24, %v1551_v30  ;;  %v1558_v33 = vmul.f32 %v2190_v31, %v1546_v23  ;;  %vm1564_vm7 = vweird.f32 %v2190_v31 }
 0xf91   :  { %vm1565_vm12 = vmor %vm1563_vm11, %vm1564_vm7 }
 0xf92   :  { %v1559_v35 = vmul.f32 %v2190_v31, %v1558_v33  ;;  %v1556_v36 = vsel %vm1555_vm6, %v2188_v24, %v1552_v32 }
 0xf93   :  { %v1567_v41 = vmul.f32 %v1556_v36, %v1533_v8 }
 0xf94   :  { %v1560_v37 = vmul.f32 0.5, %v1559_v35 }
 0xf95   :  { %v1572_v34 = vmul.f32 %v2103_v39, %v1567_v41 }
 0xf96   :  { %v1561_v38 = vsub.f32 1.5, %v1560_v37 }
 0xf97   :  { %v1577_v29 = vadd.f32 %v2104_v27, %v1572_v34 }
 0xf98   :  { %v1562_v42 = vmul.f32 %v2190_v31, %v1561_v38 }
 0xf9a   :  { %v1566_v43 = vsel %vm1565_vm12, %v2190_v31, %v1562_v42 }
 0xf9b   :  { %v1568_v44 = vmul.f32 %v1566_v43, %v1534_v47 }
 0xf9d   :  { %v1573_v55 = vmul.f32 %v2103_v39, %v1568_v44 }
 0xf9f   :  { %v1578_v45 = vadd.f32 %v2104_v27, %v1573_v55 }
 0xfa1   :  { %v1579_v40 = vpack.c.bf16 %v1578_v45, %v1577_v29 }
 0xfa3   :  { %1984 = vmatmul.msk.bf16.vlgmr.msra.gmra.mxu1 %vm181_vm3, %v1579_v40  ;;  %v2107_v40 = vld [vmem:[%s2837_s15 + $0x1] ss:$0 sm:$0xff]  ;;  %s2245_s15 = smov [#allocation2]  }
0x1020   :  { %v1614_v51 = vpop.f32.mrf.mxu1 }
0x1021   :  { %v1615_v21 = vadd.f32 %v2105_v50, %v1614_v51 }
0x1023   :  { %v1619_v54 = vmul.f32 %v1615_v21, %v1615_v21 }
0x1025   :  { %v1621_v56 = vmul.f32 %v1619_v54, %v1615_v21 }
0x1027   :  { %v1623_v22 = vmul.f32 0.044715, %v1621_v56 }
0x1028   :  { %v1616_v62 = vpop.f32.mrf.mxu1 }
0x1029   :  { %v1625_v57 = vadd.f32 %v1623_v22, %v1615_v21  ;;  %v1617_v58 = vadd.f32 %v2105_v50, %v1616_v62 }
0x102b   :  { %v1627_v60 = vmul.f32 0.7978846, %v1625_v57  ;;  %v1620_v61 = vmul.f32 %v1617_v58, %v1617_v58 }
0x102d   :  { %v1622_v63 = vmul.f32 %v1620_v61, %v1617_v58  ;;  %2191 = vtanh.f32 %v1627_v60 }
0x102f   :  { %v1624_v0 = vmul.f32 0.044715, %v1622_v63 }
0x1031   :  { %v1626_v1 = vadd.f32 %v1624_v0, %v1617_v58 }
0x1033   :  { %v1628_v2 = vmul.f32 0.7978846, %v1626_v1  ;;  %v2192_v3 = vpop.eup %2191  ;;  %v1763_v1 = vpop.permute.xlu0 %1762 }
0x1034   :  { %v1631_v4 = vadd.f32 1.0, %v2192_v3 }
0x1035   :  { %2193 = vtanh.f32 %v1628_v2 }
0x1036   :  { %v1633_v6 = vmul.f32 0.5, %v1631_v4 }
0x1038   :  { %v1635_v46 = vmul.f32 %v1633_v6, %v1615_v21  ;;  %v1758_v21 = vpop.permute.xlu2 %1757 }
0x103b   :  { %v2194_v5 = vpop.eup %2193 }
0x103c   :  { %v1632_v7 = vadd.f32 1.0, %v2194_v5 }
0x103e   :  { %v1634_v8 = vmul.f32 0.5, %v1632_v7 }
0x1040   :  { %v1636_v9 = vmul.f32 %v1634_v8, %v1617_v58 }
0x1042   :  { %v1637_v10 = vpack.c.bf16 %v1636_v9, %v1635_v46 }
0x1044   :  { %2010 = vmatmul.msk.bf16.vlgmr.msra.gmra.mxu2 %vm881_vm15, %v1637_v10 }
0x10c7   :  { %v1688_v47 = vpop.f32.mrf.mxu2 }
0x10c8   :  { %v1689_v12 = vadd.f32 %v2106_v11, %v1688_v47 }
0x10ca   :  { %v1693_v13 = vadd.f32 %v1689_v12, %v1577_v29 }
0x10cc   :  { %v1699_v14 = vsel %vm181_vm3, %v1693_v13, 0.0 }
0x10cd   :  { %1700 = vadd.xlane.f32.xlu1 %v1699_v14 }
0x10cf   :  { %v1690_v15 = vpop.f32.mrf.mxu2 }
0x10d0   :  { %v1691_v17 = vadd.f32 %v2106_v11, %v1690_v15 }
0x10d2   :  { %v1694_v16 = vadd.f32 %v1691_v17, %v1578_v45 }
0x10d4   :  { %v1702_v18 = vsel %vm181_vm3, %v1694_v16, 0.0 }
0x10d5   :  { %1703 = vadd.xlane.f32.xlu1 %v1702_v18 }
0x1140   :  { %v1701_v20 = vpop.xlane.xlu1 %1700 }
0x1141   :  { %v1705_v24 = vmul.f32 %v1701_v20, %v2537_v53 }
0x1143   :  { %v1707_v23 = vsub.f32 %v1693_v13, %v1705_v24 }
0x1145   :  { %v1709_v25 = vmul.f32 %v1707_v23, %v1707_v23 }
0x1147   :  { %v1711_v26 = vsel %vm181_vm3, %v1709_v25, 0.0 }
0x1148   :  { %1712 = vadd.xlane.f32.xlu1 %v1711_v26  ;;  %v1704_v28 = vpop.xlane.xlu1 %1703 }
0x1149   :  { %v1706_v30 = vmul.f32 %v1704_v28, %v2537_v53 }
0x114b   :  { %v1708_v31 = vsub.f32 %v1694_v16, %v1706_v30 }
0x114d   :  { %v1710_v32 = vmul.f32 %v1708_v31, %v1708_v31 }
0x114f   :  { %v1714_v33 = vsel %vm181_vm3, %v1710_v32, 0.0 }
0x1150   :  { %1715 = vadd.xlane.f32.xlu1 %v1714_v33 }
0x11bb   :  { %v1713_v35 = vpop.xlane.xlu1 %1712 }
0x11bc   :  { %v1717_v36 = vmul.f32 %v1713_v35, %v2537_v53 }
0x11be   :  { %v1719_v37 = vadd.f32 1e-12, %v1717_v36 }
0x11c0   :  { %2195 = vrsqrt.f32 %v1719_v37  ;;  %vm1727_vm14 = vweird.f32 %v1719_v37 }
0x11c3   :  { %v1716_v38 = vpop.xlane.xlu1 %1715 }
0x11c4   :  { %v1718_v39 = vmul.f32 %v1716_v38, %v2537_v53  ;;  %v2108_v53 = vld [vmem:[%s2838_s16 + $0x1] ss:$0 sm:$0xff]  ;;  %s1820_s16 = sshll.u32 %s2245_s15, 4  ;;  %s1821_s16 = int_to_ptr.vmem [resolvable:$true] %s1820_s16 }
0x11c6   :  { %v2196_v41 = vpop.eup %2195  ;;  %v1720_v42 = vadd.f32 1e-12, %v1718_v39 }
0x11c7   :  { %v1722_v43 = vmul.f32 %v2196_v41, %v1719_v37  ;;  %vm1728_vm13 = vweird.f32 %v2196_v41 }
0x11c8   :  { %2197 = vrsqrt.f32 %v1720_v42  ;;  %vm1729_vm15 = vmor %vm1727_vm14, %vm1728_vm13  ;;  %vm1737_vm1 = vweird.f32 %v1720_v42 }
0x11c9   :  { %v1723_v27 = vmul.f32 %v2196_v41, %v1722_v43 }
0x11cb   :  { %v1724_v34 = vmul.f32 0.5, %v1723_v27 }
0x11cd   :  { %v1725_v44 = vsub.f32 1.5, %v1724_v34 }
0x11ce   :  { %v2198_v55 = vpop.eup %2197 }
0x11cf   :  { %v1726_v29 = vmul.f32 %v2196_v41, %v1725_v44  ;;  %v1732_v45 = vmul.f32 %v2198_v55, %v1720_v42  ;;  %vm1738_vm0 = vweird.f32 %v2198_v55 }
0x11d0   :  { %vm1739_vm2 = vmor %vm1737_vm1, %vm1738_vm0 }
0x11d1   :  { %v1733_v49 = vmul.f32 %v2198_v55, %v1732_v45  ;;  %v1730_v48 = vsel %vm1729_vm15, %v2196_v41, %v1726_v29 }
0x11d2   :  { %v1741_v59 = vmul.f32 %v1730_v48, %v1707_v23 }
0x11d3   :  { %v1734_v50 = vmul.f32 0.5, %v1733_v49 }
0x11d4   :  { %v1746_v51 = vmul.f32 %v2107_v40, %v1741_v59 }
0x11d5   :  { %v1735_v52 = vsub.f32 1.5, %v1734_v50 }
0x11d6   :  { %v1751_v54 = vadd.f32 %v2108_v53, %v1746_v51 }
0x11d7   :  { %v1736_v56 = vmul.f32 %v2198_v55, %v1735_v52 }
0x11d8   :  { %v1765_v22 = vmul.f32 %v1758_v21, %v1751_v54 }
0x11d9   :  { %v1740_v62 = vsel %vm1739_vm2, %v2198_v55, %v1736_v56 }
0x11da   :  { %v1742_v57 = vmul.f32 %v1740_v62, %v1708_v31  ;;  %v1767_v58 = vsel %vm181_vm3, %v1765_v22, 0.0 }
0x11db   :  { %v1768_v60 = vrot.slane %v1767_v58, 4 }
0x11dc   :  { %v1747_v61 = vmul.f32 %v2107_v40, %v1742_v57 }
0x11dd   :  { %v1769_v63 = vadd.f32 %v1768_v60, %v1767_v58 }
0x11de   :  { %v1752_v0 = vadd.f32 %v2108_v53, %v1747_v61 }
0x11df   :  { %v1770_v2 = vrot.slane %v1769_v63, 2 }
0x11e0   :  { %v1766_v3 = vmul.f32 %v1763_v1, %v1752_v0 }
0x11e1   :  { %v1771_v5 = vadd.f32 %v1770_v2, %v1769_v63 }
0x11e2   :  { %v1774_v4 = vsel %vm181_vm3, %v1766_v3, 0.0 }
0x11e3   :  { %v1775_v6 = vrot.slane %v1774_v4, 4  ;;  %v1772_v8 = vrot.slane %v1771_v5, 1 }
0x11e5   :  { %v1776_v7 = vadd.f32 %v1775_v6, %v1774_v4  ;;  %v1773_v10 = vadd.f32 %v1772_v8, %v1771_v5 }
0x11e7   :  { %v1777_v46 = vrot.slane %v1776_v7, 2  ;;  %v1781_v12 = vmul.f32 %v1773_v10, %v1773_v10 }
0x11e9   :  { %v1778_v9 = vadd.f32 %v1777_v46, %v1776_v7 }
0x11eb   :  { %v1779_v11 = vrot.slane %v1778_v9, 1 }
0x11ed   :  { %v1780_v47 = vadd.f32 %v1779_v11, %v1778_v9 }
0x11ef   :  { %v1782_v13 = vmul.f32 %v1780_v47, %v1780_v47 }
0x11f1   :  { %v1786_v14 = vsel %vm1785_vm8, %v1782_v13, %v1781_v12 }
0x11f2   :  { %v1789_v15 = vsel %vm1788_vm9, %v1786_v14, 0.0 }
0x11f3   :  { %1790 = vadd.xlane.f32.xlu1 %v1789_v15 }
0x1266   :  { %v1791_v17 = vpop.xlane.xlu1 %1790 }
0x1267   :  { %v1792_v16 = vadd.f32 1e-12, %v1791_v17 }
0x1269   :  { %2199 = vrsqrt.f32 %v1792_v16  ;;  %vm1799_vm10 = vweird.f32 %v1792_v16 }
0x126f   :  { %v2200_v18 = vpop.eup %2199 }
0x1270   :  { %v1794_v19 = vmul.f32 %v2200_v18, %v1792_v16  ;;  %vm1800_vm3 = vweird.f32 %v2200_v18 }
0x1271   :  { %vm1801_vm4 = vmor %vm1799_vm10, %vm1800_vm3 }
0x1272   :  { %v1795_v20 = vmul.f32 %v2200_v18, %v1794_v19 }
0x1274   :  { %v1796_v24 = vmul.f32 0.5, %v1795_v20 }
0x1276   :  { %v1797_v23 = vsub.f32 1.5, %v1796_v24 }
0x1278   :  { %v1798_v25 = vmul.f32 %v2200_v18, %v1797_v23 }
0x127a   :  { %v1802_v26 = vsel %vm1801_vm4, %v2200_v18, %v1798_v25 }
0x127b   :  { %v1804_v28 = vrot.slane %v1802_v26, 1  ;;  %v1807_v31 = vmul.f32 %v1802_v26, %v1773_v10 }
0x127d   :  { %v1808_v30 = vmul.f32 %v1804_v28, %v1780_v47 }
0x127f   :  { %v1811_v32 = vrot.slane %v1808_v30, 7 }
0x1281   :  { %v1812_v33 = vsel %vm1785_vm8, %v1811_v32, %v1807_v31 }
0x1282   :  { %1814 = vst.msk [vmem:[#allocation2] sm:$0x3] %vm1788_vm9, %v1812_v33 }
0x1283   :  { %1825 = dma.vmem_to_hbm [thread:$0]  %s1821_s16, 32, %s1823_s8, [#allocation3]  }
0x1284   :  { %2226 = dma.done.wait [#allocation3], 32  }
0x1285   :  { %2227 = vsyncadd [#allocation3], 4294967264 }
0x1286   :  { %1830 = vsyncpa [#allocation3], 1 }

</bundles_post_ra>
